<compile_context>
chip_gen: v6e
topology: v6e:2x2x1
jax: 0.10.0
libtpu: 0.0.40
codegen_flags: <defaults>
</compile_context>

<pallas_src>
import functools

import jax
import jax.numpy as jnp
import numpy as np
from jax.experimental import pallas as pl
from jax.experimental.pallas import tpu as pltpu

# Model geometry (fixed by the module: dim_out=24 and dim_out=8 imply 28x28 in).
K = 5                    # conv kernel size (both layers)
CH1 = 12                 # conv1 output channels
CH2 = 64                 # conv2 output channels
HIN = 28                 # input spatial size (MNIST)
H1 = HIN - K + 1         # 24 : conv1 output spatial
HP = H1 // 2             # 12 : pooled spatial
H2 = HP - K + 1          # 8  : conv2 output spatial


# ----------------------------------------------------------------------------
# Pallas kernel: one sample, fully fused, all intermediates in VMEM / vregs.
# ----------------------------------------------------------------------------
def _fused_forward_kernel(x_ref, w1b_ref, b1_ref, pw_ref, ph_ref,
                          w2b_ref, b2_ref, o_ref):
    xs = x_ref[0]                                            # (28, 28) f32

    # ---- conv1: 5 banded matmuls along W (j folded into w1b), summed over i.
    #      h[hrow, w*CH1 + co] = sum_i sum_w' x[hrow+i, w'] * w1b[i, w', w*CH1+co]
    h = jnp.dot(xs[0:H1, :], w1b_ref[0], preferred_element_type=jnp.float32)
    for ki in range(1, K):
        h = h + jnp.dot(xs[ki:ki + H1, :], w1b_ref[ki],
                        preferred_element_type=jnp.float32)
    h = jnp.maximum(h + b1_ref[...], 0.0)                    # (24, 288) ReLU

    # ---- exact 2x2 average pool via selection matmuls (lanes, then sublanes).
    p = jnp.dot(h, pw_ref[...], preferred_element_type=jnp.float32)   # (24, 144)
    p = jnp.dot(ph_ref[...], p, preferred_element_type=jnp.float32)   # (12, 144)

    # ---- conv2: same banded-matmul trick; output layout [qh, qw*CH2 + co].
    o = jnp.dot(p[0:H2, :], w2b_ref[0], preferred_element_type=jnp.float32)
    for ki in range(1, K):
        o = o + jnp.dot(p[ki:ki + H2, :], w2b_ref[ki],
                        preferred_element_type=jnp.float32)
    o = jnp.maximum(o + b2_ref[...], 0.0)                    # (8, 512) ReLU

    o_ref[0] = o.astype(o_ref.dtype)                         # lane-dense store


# ----------------------------------------------------------------------------
# Wrapper: build the constant banded / pooling matrices and call the kernel.
# ----------------------------------------------------------------------------
def _band_matrices(w1, b1, w2, b2):
    """Fold the conv j-offsets and the 2x2 pool into constant matmul operands."""
    f32 = jnp.float32

    # conv1: w1b[ki, w_in, w_out*CH1 + co] = w1[co, 0, ki, w_in - w_out] (banded)
    dj1 = jnp.arange(HIN)[:, None] - jnp.arange(H1)[None, :]           # (28, 24)
    m1 = ((dj1 >= 0) & (dj1 < K)).astype(f32)
    w1k = jnp.transpose(w1[:, 0], (1, 2, 0))                           # (5, 5, 12)
    w1b = w1k[:, jnp.clip(dj1, 0, K - 1), :] * m1[None, :, :, None]    # (5,28,24,12)
    w1b = w1b.reshape(K, HIN, H1 * CH1)                                # (5, 28, 288)
    b1r = jnp.tile(b1, H1).reshape(1, H1 * CH1)                        # (1, 288)

    # 2x2 average pool = 0.5-selection along W (lanes) then along H (sublanes).
    sel_w = 0.5 * (jnp.arange(H1)[:, None] // 2 ==
                   jnp.arange(HP)[None, :]).astype(f32)                # (24, 12)
    pool_w = (sel_w[:, None, :, None] *
              jnp.eye(CH1, dtype=f32)[None, :, None, :])               # (24,12,12,12)
    pool_w = pool_w.reshape(H1 * CH1, HP * CH1)                        # (288, 144)
    pool_h = 0.5 * (jnp.arange(H1)[None, :] // 2 ==
                    jnp.arange(HP)[:, None]).astype(f32)               # (12, 24)

    # conv2: w2b[ki, pw*CH1 + c, qw*CH2 + co] = w2[co, c, ki, pw - qw] (banded)
    dj2 = jnp.arange(HP)[:, None] - jnp.arange(H2)[None, :]            # (12, 8)
    m2 = ((dj2 >= 0) & (dj2 < K)).astype(f32)
    w2k = jnp.transpose(w2, (2, 3, 1, 0))                              # (5, 5, 12, 64)
    w2b = w2k[:, jnp.clip(dj2, 0, K - 1), :, :] * m2[None, :, :, None, None]
    w2b = jnp.transpose(w2b, (0, 1, 3, 2, 4)).reshape(K, HP * CH1, H2 * CH2)
    b2r = jnp.tile(b2, H2).reshape(1, H2 * CH2)                        # (1, 512)

    return w1b, b1r, pool_w, pool_h, w2b, b2r


def fused_mnist_forward(x_nchw, params):
    """x: (N, 1, 28, 28) f32 -> (N, 64, 8, 8) f32 via one fused Pallas kernel."""
    w1, b1, w2, b2 = params
    N = x_nchw.shape[0]
    xs = x_nchw.reshape(N, HIN, HIN)                 # squeeze the single channel
    w1b, b1r, pool_w, pool_h, w2b, b2r = _band_matrices(w1, b1, w2, b2)

    out = pl.pallas_call(
        _fused_forward_kernel,
        out_shape=jax.ShapeDtypeStruct((N, H2, H2 * CH2), jnp.float32),
        grid_spec=pltpu.PrefetchScalarGridSpec(
            num_scalar_prefetch=0,
            grid=(N,),                               # one sample per grid step
            in_specs=[
                pl.BlockSpec((1, HIN, HIN), lambda n: (n, 0, 0)),
                # constant operands: same block every step -> fetched once,
                # stay resident in VMEM (~1.8 MiB total, fits every chip gen).
                pl.BlockSpec((K, HIN, H1 * CH1), lambda n: (0, 0, 0)),
                pl.BlockSpec((1, H1 * CH1), lambda n: (0, 0)),
                pl.BlockSpec((H1 * CH1, HP * CH1), lambda n: (0, 0)),
                pl.BlockSpec((HP, H1), lambda n: (0, 0)),
                pl.BlockSpec((K, HP * CH1, H2 * CH2), lambda n: (0, 0, 0)),
                pl.BlockSpec((1, H2 * CH2), lambda n: (0, 0)),
            ],
            out_specs=pl.BlockSpec((1, H2, H2 * CH2), lambda n: (n, 0, 0)),
        ),
        compiler_params=pltpu.CompilerParams(
            dimension_semantics=("parallel",)),      # batch steps shard over TCs
    )(xs, w1b, b1r, pool_w, pool_h, w2b, b2r)

    # (N, 8, 512) with columns ordered (qw, co)  ->  NCHW (N, 64, 8, 8).
    # Tiny final relayout (16 KiB/sample) done in XLA, outside the hot path.
    return out.reshape(N, H2, H2, CH2).transpose(0, 3, 1, 2)


# ----------------------------------------------------------------------------
# Parameter init (matches Conv2d(1,12,5) and Conv2d(12,64,5))
# ----------------------------------------------------------------------------
def init_params(key):
    k1, k2, k3, k4 = jax.random.split(key, 4)
    w1 = jax.random.normal(k1, (CH1, 1, K, K), jnp.float32) * np.sqrt(2.0 / (1 * K * K))
    b1 = jax.random.normal(k2, (CH1,), jnp.float32) * 0.01
    w2 = jax.random.normal(k3, (CH2, CH1, K, K), jnp.float32) * np.sqrt(2.0 / (CH1 * K * K))
    b2 = jax.random.normal(k4, (CH2,), jnp.float32) * 0.01
    return (w1, b1, w2, b2)


# ----------------------------------------------------------------------------
# MNISTCNN.forward
# ----------------------------------------------------------------------------
@functools.partial(jax.jit, static_argnames=("time_window",))
def mnist_cnn_forward(x, y, y_onehot, params, time_window=10):
    del y, y_onehot  # only used by the (unavailable) local-loss blocks
    # TODO(synk): LocalLossBlockConv local losses (FELL/BELL/ELL) and the spiking
    # time-window dynamics are not modeled; loss_total stays 0.0.
    loss_total = jnp.float32(0.0)
    out = fused_mnist_forward(x, params)             # (N, 64, 8, 8)
    return out, loss_total


# ----------------------------------------------------------------------------
# Pure-JAX reference (lax.conv) for the correctness check.
# ----------------------------------------------------------------------------
def _avg_pool_2x2_nchw(x):
    N, C, H, W = x.shape
    return x.reshape(N, C, H // 2, 2, W // 2, 2).mean(axis=(3, 5))


def _reference_forward(x, params):
    w1, b1, w2, b2 = params
    dn = jax.lax.conv_dimension_numbers(x.shape, w1.shape, ("NCHW", "OIHW", "NCHW"))
    h = jax.lax.conv_general_dilated(x, w1, (1, 1), "VALID", dimension_numbers=dn)
    h = jax.nn.relu(h + b1[None, :, None, None])
    h = _avg_pool_2x2_nchw(h)
    dn2 = jax.lax.conv_dimension_numbers(h.shape, w2.shape, ("NCHW", "OIHW", "NCHW"))
    h = jax.lax.conv_general_dilated(h, w2, (1, 1), "VALID", dimension_numbers=dn2)
    h = jax.nn.relu(h + b2[None, :, None, None])
    return h


if __name__ == "__main__":
    key = jax.random.PRNGKey(0)
    kx, ky, kp = jax.random.split(key, 3)

    batch = 2
    x = jax.random.normal(kx, (batch, 1, HIN, HIN), jnp.float32)   # MNIST-shaped
    y = jax.random.randint(ky, (batch,), 0, 10, jnp.int32)
    y_onehot = jax.nn.one_hot(y, 10, dtype=jnp.float32)

    params = init_params(kp)

    out, loss_total = mnist_cnn_forward(x, y, y_onehot, params, time_window=10)
    out = jax.block_until_ready(out)
    loss_total = jax.block_until_ready(loss_total)

    assert out.shape == (batch, CH2, H2, H2), out.shape

    ref = jax.block_until_ready(_reference_forward(x, params))
    np.testing.assert_allclose(np.asarray(out), np.asarray(ref),
                               atol=1e-3, rtol=1e-3)

    print("KERNEL_OK")
</pallas_src>

<mosaic_0001>
module attributes {stable_mosaic.version = 11 : i64} {
  func.func @_fused_forward_kernel(%arg0: i32, %arg1: memref<1x28x28xf32, #tpu.memory_space<vmem>>, %arg2: memref<5x28x288xf32, #tpu.memory_space<vmem>>, %arg3: memref<1x288xf32, #tpu.memory_space<vmem>>, %arg4: memref<288x144xf32, #tpu.memory_space<vmem>>, %arg5: memref<12x24xf32, #tpu.memory_space<vmem>>, %arg6: memref<5x144x512xf32, #tpu.memory_space<vmem>>, %arg7: memref<1x512xf32, #tpu.memory_space<vmem>>, %arg8: memref<1x8x512xf32, #tpu.memory_space<vmem>>) attributes {dimension_semantics = [#tpu.dimension_semantics<parallel>], iteration_bounds = array<i64: 2>, scalar_prefetch = 0 : i64, scratch_operands = 0 : i64, tpu.core_type = #tpu.core_type<tc>, window_params = [{transform_indices = @transform_0, window_bounds = array<i64: 1, 28, 28>}, {pipeline_mode = #tpu.pipeline_mode<synchronous>, transform_indices = @transform_1, window_bounds = array<i64: 5, 28, 288>}, {pipeline_mode = #tpu.pipeline_mode<synchronous>, transform_indices = @transform_2, window_bounds = array<i64: 1, 288>}, {pipeline_mode = #tpu.pipeline_mode<synchronous>, transform_indices = @transform_3, window_bounds = array<i64: 288, 144>}, {pipeline_mode = #tpu.pipeline_mode<synchronous>, transform_indices = @transform_4, window_bounds = array<i64: 12, 24>}, {pipeline_mode = #tpu.pipeline_mode<synchronous>, transform_indices = @transform_5, window_bounds = array<i64: 5, 144, 512>}, {pipeline_mode = #tpu.pipeline_mode<synchronous>, transform_indices = @transform_6, window_bounds = array<i64: 1, 512>}, {transform_indices = @transform_7, window_bounds = array<i64: 1, 8, 512>}]} {
    %c0 = arith.constant 0 : index
    %c0_0 = arith.constant 0 : index
    %c0_1 = arith.constant 0 : index
    %0 = vector.load %arg1[%c0, %c0_0, %c0_1] : memref<1x28x28xf32, #tpu.memory_space<vmem>>, vector<1x28x28xf32>
    %1 = vector.shape_cast %0 : vector<1x28x28xf32> to vector<28x28xf32>
    %2 = vector.extract_strided_slice %1 {offsets = [0, 0], sizes = [24, 28], strides = [1, 1]} : vector<28x28xf32> to vector<24x28xf32>
    %c0_2 = arith.constant 0 : index
    %c0_3 = arith.constant 0 : index
    %c0_4 = arith.constant 0 : index
    %3 = vector.load %arg2[%c0_2, %c0_3, %c0_4] : memref<5x28x288xf32, #tpu.memory_space<vmem>>, vector<1x28x288xf32>
    %4 = vector.shape_cast %3 : vector<1x28x288xf32> to vector<28x288xf32>
    %cst = arith.constant dense<0.000000e+00> : vector<24x288xf32>
    %5 = tpu.matmul %2, %4, %cst {dimension_numbers = #tpu.dot_dimension_numbers<[1], [0], [0], [1], [0, 0, 1, 1], [], []>} : vector<24x28xf32>, vector<28x288xf32>, vector<24x288xf32> -> vector<24x288xf32>
    %6 = vector.extract_strided_slice %1 {offsets = [1, 0], sizes = [24, 28], strides = [1, 1]} : vector<28x28xf32> to vector<24x28xf32>
    %c1 = arith.constant 1 : index
    %c0_5 = arith.constant 0 : index
    %c0_6 = arith.constant 0 : index
    %7 = vector.load %arg2[%c1, %c0_5, %c0_6] : memref<5x28x288xf32, #tpu.memory_space<vmem>>, vector<1x28x288xf32>
    %8 = vector.shape_cast %7 : vector<1x28x288xf32> to vector<28x288xf32>
    %cst_7 = arith.constant dense<0.000000e+00> : vector<24x288xf32>
    %9 = tpu.matmul %6, %8, %cst_7 {dimension_numbers = #tpu.dot_dimension_numbers<[1], [0], [0], [1], [0, 0, 1, 1], [], []>} : vector<24x28xf32>, vector<28x288xf32>, vector<24x288xf32> -> vector<24x288xf32>
    %10 = arith.addf %5, %9 : vector<24x288xf32>
    %11 = vector.extract_strided_slice %1 {offsets = [2, 0], sizes = [24, 28], strides = [1, 1]} : vector<28x28xf32> to vector<24x28xf32>
    %c2 = arith.constant 2 : index
    %c0_8 = arith.constant 0 : index
    %c0_9 = arith.constant 0 : index
    %12 = vector.load %arg2[%c2, %c0_8, %c0_9] : memref<5x28x288xf32, #tpu.memory_space<vmem>>, vector<1x28x288xf32>
    %13 = vector.shape_cast %12 : vector<1x28x288xf32> to vector<28x288xf32>
    %cst_10 = arith.constant dense<0.000000e+00> : vector<24x288xf32>
    %14 = tpu.matmul %11, %13, %cst_10 {dimension_numbers = #tpu.dot_dimension_numbers<[1], [0], [0], [1], [0, 0, 1, 1], [], []>} : vector<24x28xf32>, vector<28x288xf32>, vector<24x288xf32> -> vector<24x288xf32>
    %15 = arith.addf %10, %14 : vector<24x288xf32>
    %16 = vector.extract_strided_slice %1 {offsets = [3, 0], sizes = [24, 28], strides = [1, 1]} : vector<28x28xf32> to vector<24x28xf32>
    %c3 = arith.constant 3 : index
    %c0_11 = arith.constant 0 : index
    %c0_12 = arith.constant 0 : index
    %17 = vector.load %arg2[%c3, %c0_11, %c0_12] : memref<5x28x288xf32, #tpu.memory_space<vmem>>, vector<1x28x288xf32>
    %18 = vector.shape_cast %17 : vector<1x28x288xf32> to vector<28x288xf32>
    %cst_13 = arith.constant dense<0.000000e+00> : vector<24x288xf32>
    %19 = tpu.matmul %16, %18, %cst_13 {dimension_numbers = #tpu.dot_dimension_numbers<[1], [0], [0], [1], [0, 0, 1, 1], [], []>} : vector<24x28xf32>, vector<28x288xf32>, vector<24x288xf32> -> vector<24x288xf32>
    %20 = arith.addf %15, %19 : vector<24x288xf32>
    %21 = vector.extract_strided_slice %1 {offsets = [4, 0], sizes = [24, 28], strides = [1, 1]} : vector<28x28xf32> to vector<24x28xf32>
    %c4 = arith.constant 4 : index
    %c0_14 = arith.constant 0 : index
    %c0_15 = arith.constant 0 : index
    %22 = vector.load %arg2[%c4, %c0_14, %c0_15] : memref<5x28x288xf32, #tpu.memory_space<vmem>>, vector<1x28x288xf32>
    %23 = vector.shape_cast %22 : vector<1x28x288xf32> to vector<28x288xf32>
    %cst_16 = arith.constant dense<0.000000e+00> : vector<24x288xf32>
    %24 = tpu.matmul %21, %23, %cst_16 {dimension_numbers = #tpu.dot_dimension_numbers<[1], [0], [0], [1], [0, 0, 1, 1], [], []>} : vector<24x28xf32>, vector<28x288xf32>, vector<24x288xf32> -> vector<24x288xf32>
    %25 = arith.addf %20, %24 : vector<24x288xf32>
    %c0_17 = arith.constant 0 : index
    %c0_18 = arith.constant 0 : index
    %26 = vector.load %arg3[%c0_17, %c0_18] : memref<1x288xf32, #tpu.memory_space<vmem>>, vector<1x288xf32>
    %27 = vector.broadcast %26 : vector<1x288xf32> to vector<24x288xf32>
    %28 = arith.addf %25, %27 : vector<24x288xf32>
    %cst_19 = arith.constant 0.000000e+00 : f32
    %29 = vector.broadcast %cst_19 : f32 to vector<24x288xf32>
    %30 = arith.maximumf %28, %29 : vector<24x288xf32>
    %c0_20 = arith.constant 0 : index
    %c0_21 = arith.constant 0 : index
    %31 = vector.load %arg4[%c0_20, %c0_21] : memref<288x144xf32, #tpu.memory_space<vmem>>, vector<288x144xf32>
    %cst_22 = arith.constant dense<0.000000e+00> : vector<24x144xf32>
    %32 = tpu.matmul %30, %31, %cst_22 {dimension_numbers = #tpu.dot_dimension_numbers<[1], [0], [0], [1], [0, 0, 1, 1], [], []>} : vector<24x288xf32>, vector<288x144xf32>, vector<24x144xf32> -> vector<24x144xf32>
    %c0_23 = arith.constant 0 : index
    %c0_24 = arith.constant 0 : index
    %33 = vector.load %arg5[%c0_23, %c0_24] : memref<12x24xf32, #tpu.memory_space<vmem>>, vector<12x24xf32>
    %cst_25 = arith.constant dense<0.000000e+00> : vector<12x144xf32>
    %34 = tpu.matmul %33, %32, %cst_25 {dimension_numbers = #tpu.dot_dimension_numbers<[1], [0], [0], [1], [0, 0, 1, 1], [], []>} : vector<12x24xf32>, vector<24x144xf32>, vector<12x144xf32> -> vector<12x144xf32>
    %35 = vector.extract_strided_slice %34 {offsets = [0, 0], sizes = [8, 144], strides = [1, 1]} : vector<12x144xf32> to vector<8x144xf32>
    %c0_26 = arith.constant 0 : index
    %c0_27 = arith.constant 0 : index
    %c0_28 = arith.constant 0 : index
    %36 = vector.load %arg6[%c0_26, %c0_27, %c0_28] : memref<5x144x512xf32, #tpu.memory_space<vmem>>, vector<1x144x512xf32>
    %37 = vector.shape_cast %36 : vector<1x144x512xf32> to vector<144x512xf32>
    %cst_29 = arith.constant dense<0.000000e+00> : vector<8x512xf32>
    %38 = tpu.matmul %35, %37, %cst_29 {dimension_numbers = #tpu.dot_dimension_numbers<[1], [0], [0], [1], [0, 0, 1, 1], [], []>} : vector<8x144xf32>, vector<144x512xf32>, vector<8x512xf32> -> vector<8x512xf32>
    %39 = vector.extract_strided_slice %34 {offsets = [1, 0], sizes = [8, 144], strides = [1, 1]} : vector<12x144xf32> to vector<8x144xf32>
    %c1_30 = arith.constant 1 : index
    %c0_31 = arith.constant 0 : index
    %c0_32 = arith.constant 0 : index
    %40 = vector.load %arg6[%c1_30, %c0_31, %c0_32] : memref<5x144x512xf32, #tpu.memory_space<vmem>>, vector<1x144x512xf32>
    %41 = vector.shape_cast %40 : vector<1x144x512xf32> to vector<144x512xf32>
    %cst_33 = arith.constant dense<0.000000e+00> : vector<8x512xf32>
    %42 = tpu.matmul %39, %41, %cst_33 {dimension_numbers = #tpu.dot_dimension_numbers<[1], [0], [0], [1], [0, 0, 1, 1], [], []>} : vector<8x144xf32>, vector<144x512xf32>, vector<8x512xf32> -> vector<8x512xf32>
    %43 = arith.addf %38, %42 : vector<8x512xf32>
    %44 = vector.extract_strided_slice %34 {offsets = [2, 0], sizes = [8, 144], strides = [1, 1]} : vector<12x144xf32> to vector<8x144xf32>
    %c2_34 = arith.constant 2 : index
    %c0_35 = arith.constant 0 : index
    %c0_36 = arith.constant 0 : index
    %45 = vector.load %arg6[%c2_34, %c0_35, %c0_36] : memref<5x144x512xf32, #tpu.memory_space<vmem>>, vector<1x144x512xf32>
    %46 = vector.shape_cast %45 : vector<1x144x512xf32> to vector<144x512xf32>
    %cst_37 = arith.constant dense<0.000000e+00> : vector<8x512xf32>
    %47 = tpu.matmul %44, %46, %cst_37 {dimension_numbers = #tpu.dot_dimension_numbers<[1], [0], [0], [1], [0, 0, 1, 1], [], []>} : vector<8x144xf32>, vector<144x512xf32>, vector<8x512xf32> -> vector<8x512xf32>
    %48 = arith.addf %43, %47 : vector<8x512xf32>
    %49 = vector.extract_strided_slice %34 {offsets = [3, 0], sizes = [8, 144], strides = [1, 1]} : vector<12x144xf32> to vector<8x144xf32>
    %c3_38 = arith.constant 3 : index
    %c0_39 = arith.constant 0 : index
    %c0_40 = arith.constant 0 : index
    %50 = vector.load %arg6[%c3_38, %c0_39, %c0_40] : memref<5x144x512xf32, #tpu.memory_space<vmem>>, vector<1x144x512xf32>
    %51 = vector.shape_cast %50 : vector<1x144x512xf32> to vector<144x512xf32>
    %cst_41 = arith.constant dense<0.000000e+00> : vector<8x512xf32>
    %52 = tpu.matmul %49, %51, %cst_41 {dimension_numbers = #tpu.dot_dimension_numbers<[1], [0], [0], [1], [0, 0, 1, 1], [], []>} : vector<8x144xf32>, vector<144x512xf32>, vector<8x512xf32> -> vector<8x512xf32>
    %53 = arith.addf %48, %52 : vector<8x512xf32>
    %54 = vector.extract_strided_slice %34 {offsets = [4, 0], sizes = [8, 144], strides = [1, 1]} : vector<12x144xf32> to vector<8x144xf32>
    %c4_42 = arith.constant 4 : index
    %c0_43 = arith.constant 0 : index
    %c0_44 = arith.constant 0 : index
    %55 = vector.load %arg6[%c4_42, %c0_43, %c0_44] : memref<5x144x512xf32, #tpu.memory_space<vmem>>, vector<1x144x512xf32>
    %56 = vector.shape_cast %55 : vector<1x144x512xf32> to vector<144x512xf32>
    %cst_45 = arith.constant dense<0.000000e+00> : vector<8x512xf32>
    %57 = tpu.matmul %54, %56, %cst_45 {dimension_numbers = #tpu.dot_dimension_numbers<[1], [0], [0], [1], [0, 0, 1, 1], [], []>} : vector<8x144xf32>, vector<144x512xf32>, vector<8x512xf32> -> vector<8x512xf32>
    %58 = arith.addf %53, %57 : vector<8x512xf32>
    %c0_46 = arith.constant 0 : index
    %c0_47 = arith.constant 0 : index
    %59 = vector.load %arg7[%c0_46, %c0_47] : memref<1x512xf32, #tpu.memory_space<vmem>>, vector<1x512xf32>
    %60 = vector.broadcast %59 : vector<1x512xf32> to vector<8x512xf32>
    %61 = arith.addf %58, %60 : vector<8x512xf32>
    %cst_48 = arith.constant 0.000000e+00 : f32
    %62 = vector.broadcast %cst_48 : f32 to vector<8x512xf32>
    %63 = arith.maximumf %61, %62 : vector<8x512xf32>
    %c0_49 = arith.constant 0 : index
    %c0_50 = arith.constant 0 : index
    %c0_51 = arith.constant 0 : index
    %64 = vector.load %arg8[%c0_49, %c0_50, %c0_51] : memref<1x8x512xf32, #tpu.memory_space<vmem>>, vector<1x8x512xf32>
    %65 = vector.shape_cast %64 : vector<1x8x512xf32> to vector<8x512xf32>
    %66 = vector.shape_cast %63 : vector<8x512xf32> to vector<1x8x512xf32>
    tpu.vector_store %arg8[%c0_49, %c0_50, %c0_51], %66 {strides = array<i32>} : memref<1x8x512xf32, #tpu.memory_space<vmem>>, vector<1x8x512xf32>,
    return
  }
  func.func @transform_0(%arg0: i32) -> (i32, i32, i32) {
    %c0_i32 = arith.constant 0 : i32
    %c0_i32_0 = arith.constant 0 : i32
    %c0_i32_1 = arith.constant 0 : i32
    return %arg0, %c0_i32, %c0_i32_0 : i32, i32, i32
  }
  func.func @transform_1(%arg0: i32) -> (i32, i32, i32) {
    %c0_i32 = arith.constant 0 : i32
    %c0_i32_0 = arith.constant 0 : i32
    %c0_i32_1 = arith.constant 0 : i32
    %c0_i32_2 = arith.constant 0 : i32
    return %c0_i32, %c0_i32_0, %c0_i32_1 : i32, i32, i32
  }
  func.func @transform_2(%arg0: i32) -> (i32, i32) {
    %c0_i32 = arith.constant 0 : i32
    %c0_i32_0 = arith.constant 0 : i32
    %c0_i32_1 = arith.constant 0 : i32
    return %c0_i32, %c0_i32_0 : i32, i32
  }
  func.func @transform_3(%arg0: i32) -> (i32, i32) {
    %c0_i32 = arith.constant 0 : i32
    %c0_i32_0 = arith.constant 0 : i32
    %c0_i32_1 = arith.constant 0 : i32
    return %c0_i32, %c0_i32_0 : i32, i32
  }
  func.func @transform_4(%arg0: i32) -> (i32, i32) {
    %c0_i32 = arith.constant 0 : i32
    %c0_i32_0 = arith.constant 0 : i32
    %c0_i32_1 = arith.constant 0 : i32
    return %c0_i32, %c0_i32_0 : i32, i32
  }
  func.func @transform_5(%arg0: i32) -> (i32, i32, i32) {
    %c0_i32 = arith.constant 0 : i32
    %c0_i32_0 = arith.constant 0 : i32
    %c0_i32_1 = arith.constant 0 : i32
    %c0_i32_2 = arith.constant 0 : i32
    return %c0_i32, %c0_i32_0, %c0_i32_1 : i32, i32, i32
  }
  func.func @transform_6(%arg0: i32) -> (i32, i32) {
    %c0_i32 = arith.constant 0 : i32
    %c0_i32_0 = arith.constant 0 : i32
    %c0_i32_1 = arith.constant 0 : i32
    return %c0_i32, %c0_i32_0 : i32, i32
  }
  func.func @transform_7(%arg0: i32) -> (i32, i32, i32) {
    %c0_i32 = arith.constant 0 : i32
    %c0_i32_0 = arith.constant 0 : i32
    %c0_i32_1 = arith.constant 0 : i32
    return %arg0, %c0_i32, %c0_i32_0 : i32, i32, i32
  }
}

</mosaic_0001>

<bundles_post_ra>
// kernel: tile.13
= control target key start
LH: loop header
LB: loop body
LE: loop exit
PB: predicated region body
PF: predicated region fallthrough
CT: control target
= control target key end

     0   :  { %s34_s0 = inlined_call_operand.vmem [shape: f32[12], index: 0, kind: input, shape index: {}]   ;;  %s35_s1 = inlined_call_operand.vmem [shape: f32[24,12], index: 1, kind: output, shape index: {}]  }
   0x1   :  { %v4_v0 = vld [vmem:[%s34_s0] ss:$0 sm:$0xff] }
   0x2   :  { %5 = vst [vmem:[%s35_s1] sm:$0xff] %v4_v0  ;;  %10 = vst [vmem:[%s35_s1 + $0x8] sm:$0xff] %v4_v0 }
   0x3   :  { %11 = vst [vmem:[%s35_s1 + $0x10] sm:$0xff] %v4_v0 }

// kernel: tile.14
= control target key start
LH: loop header
LB: loop body
LE: loop exit
PB: predicated region body
PF: predicated region fallthrough
CT: control target
= control target key end

     0   :  { %vm9_vm0 = vcmask 31744   ;;  %vm13_vm1 = vcmask 64512   ;;  %s242_s14 = smov 124   ;;  %s243_s15 = smov 112   ;;  %vm3_vm2 = vcmask 97280   ;;  %vm16_vm3 = vcmask 1048544   ;;  %s366_s0 = inlined_call_operand.vmem [shape: f32[24,12], index: 0, kind: input, shape index: {}]   ;;  %s367_s1 = inlined_call_operand.vmem [shape: f32[1,288], index: 1, kind: output, shape index: {}]  }
   0x1   :  { %v192_v0 = vld [vmem:[%s366_s0 + $0x15] sm:$0x1]   ;;  %v196_v3 = vld [vmem:[%s366_s0 + $0x14] sm:$0x1]   ;;  %v194_v4 = vld [vmem:[%s366_s0 + $0xa] sm:$0x1]  }
   0x2   :  { %v193_v1 = vld [vmem:[%s366_s0 + $0x15] sm:$0x1]   ;;  %34 = vrot.lane.b32.xlu1 %v196_v3, %s243_s15  ;;  %v195_v5 = vld [vmem:[%s366_s0 + $0xa] sm:$0x1]   ;;  %v197_v7 = vld [vmem:[%s366_s0 + $0x9] sm:$0x1]  }
   0x3   :  { %v10_v2 = vsel %vm9_vm0, %v193_v1, %v192_v0  ;;  %v24_v6 = vsel %vm13_vm1, %v195_v5, %v194_v4  ;;  %s244_s20 = smov 120   ;;  %s245_s21 = smov 108   ;;  %v198_v8 = vld [vmem:[%s366_s0 + $0x13] sm:$0x1]   ;;  %v199_v9 = vld [vmem:[%s366_s0 + $0x8] sm:$0x1]  }
   0x4   :  { %11 = vrot.lane.b32.xlu0 %v10_v2, %s242_s14  ;;  %s246_s26 = smov 100   ;;  %s247_s27 = smov 96   ;;  %v200_v10 = vld [vmem:[%s366_s0 + $0x12] sm:$0x1]   ;;  %v201_v11 = vld [vmem:[%s366_s0 + $0x7] sm:$0x1]  }
   0x5   :  { %v2_v12 = vld [vmem:[%s366_s0] sm:$0x1]   ;;  %s248_s5 = smov 88   ;;  %s249_s6 = smov 84   ;;  %v202_v13 = vld [vmem:[%s366_s0 + $0x11] sm:$0x1]  }
   0x6   :  { %41 = vrot.lane.b32.xlu1 %v197_v7, %s245_s21  ;;  %4 = vst.msk [vmem:[#allocation0] sm:$0x1] %vm3_vm2, %v2_v12   ;;  %v203_v14 = vld [vmem:[%s366_s0 + $0x6] sm:$0x1]   ;;  %s250_s11 = smov 76   ;;  %s251_s12 = smov 72  }
   0x7   :  { %v204_v15 = vld [vmem:[%s366_s0 + $0x10] sm:$0x1]   ;;  %v205_v16 = vld [vmem:[%s366_s0 + $0x5] sm:$0x1]   ;;  %s252_s17 = smov 64   ;;  %s253_s18 = smov 60  }
   0x8   :  { %25 = vrot.lane.b32.xlu0 %v24_v6, %s244_s20  ;;  %v206_v17 = vld [vmem:[%s366_s0 + $0xf] sm:$0x1]   ;;  %v207_v18 = vld [vmem:[%s366_s0 + $0x4] sm:$0x1]   ;;  %s254_s23 = smov 52   ;;  %s255_s24 = smov 48  }
   0x9   :  { %v208_v19 = vld [vmem:[%s366_s0 + $0xe] sm:$0x1]   ;;  %v209_v20 = vld [vmem:[%s366_s0 + $0x3] sm:$0x1]   ;;  %s256_s29 = smov 40   ;;  %s257_s30 = smov 36  }
   0xa   :  { %54 = vrot.lane.b32.xlu1 %v199_v9, %s247_s27  ;;  %v210_v21 = vld [vmem:[%s366_s0 + $0xd] sm:$0x1]   ;;  %v211_v22 = vld [vmem:[%s366_s0 + $0x2] sm:$0x1]   ;;  %s259_s7 = smov 24   ;;  %s261_s13 = smov 16  }
   0xb   :  { %v212_v23 = vld [vmem:[%s366_s0 + $0x17] sm:$0x1]   ;;  %v213_v24 = vld [vmem:[%s366_s0 + $0xc] sm:$0x1]   ;;  %v214_v25 = vld [vmem:[%s366_s0 + $0x1] sm:$0x1]  }
   0xc   :  { %47 = vrot.lane.b32.xlu0 %v198_v8, %s246_s26  ;;  %v215_v26 = vld [vmem:[%s366_s0 + $0x16] sm:$0x1]   ;;  %s263_s19 = smov 8   ;;  %v216_v27 = vld [vmem:[%s366_s0 + $0xb] sm:$0x1]   ;;  %s264_s0 = smov 4  }
   0xd   :  { %vm30_vm4 = vcmask 1048512   ;;  %vm36_vm5 = vcmask 1015680   ;;  %vm43_vm6 = vcmask 982880   ;;  %vm49_vm7 = vcmask 917280  }
   0xe   :  { %67 = vrot.lane.b32.xlu1 %v201_v11, %s249_s6  ;;  %s258_s6 = smov 28   ;;  %vm56_vm8 = vcmask 884480   ;;  %vm62_vm9 = vcmask 818880   ;;  %vm69_vm10 = vcmask 786080   ;;  %vm75_vm11 = vcmask 720480  }
   0xf   :  { %vm82_vm12 = vcmask 687680   ;;  %vm88_vm13 = vcmask 622080   ;;  %vm95_vm14 = vcmask 589280   ;;  %vm101_vm15 = vcmask 523680  }
  0x10   :  { %60 = vrot.lane.b32.xlu0 %v200_v10, %s248_s5  ;;  %vm121_vm2 = vcmask 392480  }
  0x12   :  { %80 = vrot.lane.b32.xlu1 %v203_v14, %s251_s12  ;;  %s260_s12 = smov 20  }
  0x14   :  { %73 = vrot.lane.b32.xlu0 %v202_v13, %s250_s11 }
  0x16   :  { %93 = vrot.lane.b32.xlu1 %v205_v16, %s253_s18  ;;  %s262_s18 = smov 12  }
  0x18   :  { %86 = vrot.lane.b32.xlu0 %v204_v15, %s252_s17 }
  0x1a   :  { %106 = vrot.lane.b32.xlu1 %v207_v18, %s255_s24 }
  0x1c   :  { %99 = vrot.lane.b32.xlu0 %v206_v17, %s254_s23 }
  0x1e   :  { %119 = vrot.lane.b32.xlu1 %v209_v20, %s257_s30 }
  0x20   :  { %112 = vrot.lane.b32.xlu0 %v208_v19, %s256_s29 }
  0x22   :  { %132 = vrot.lane.b32.xlu1 %v211_v22, %s259_s7 }
  0x24   :  { %125 = vrot.lane.b32.xlu0 %v210_v21, %s258_s6 }
  0x26   :  { %145 = vrot.lane.b32.xlu1 %v213_v24, %s261_s13 }
  0x28   :  { %138 = vrot.lane.b32.xlu0 %v212_v23, %s260_s12 }
  0x2a   :  { %158 = vrot.lane.b32.xlu1 %v215_v26, %s263_s19 }
  0x2c   :  { %152 = vrot.lane.b32.xlu0 %v214_v25, %s262_s18 }
  0x30   :  { %165 = vrot.lane.b32.xlu0 %v216_v27, %s264_s0 }
  0x74   :  { %v35_v29 = vpop.permute.xlu1 %34  }
  0x76   :  { %v12_v28 = vpop.permute.xlu0 %11  }
  0x77   :  { %15 = vst.msk [vmem:[#allocation0 + $0x10] sm:$0x1] %vm13_vm1, %v12_v28   ;;  %vm114_vm1 = vcmask 425280  }
  0x78   :  { %18 = vst.msk [vmem:[#allocation0 + $0x8] sm:$0x1] %vm16_vm3, %v12_v28   ;;  %v42_v31 = vpop.permute.xlu1 %41   ;;  %vm127_vm3 = vcmask 326880  }
  0x7a   :  { %v26_v30 = vpop.permute.xlu0 %25  }
  0x7b   :  { %29 = vst.msk [vmem:[#allocation0 + $0x8] sm:$0x1] %vm9_vm0, %v26_v30   ;;  %vm108_vm0 = vcmask 490880  }
  0x7c   :  { %31 = vst.msk [vmem:[#allocation0] sm:$0x1] %vm30_vm4, %v26_v30   ;;  %v55_v33 = vpop.permute.xlu1 %54   ;;  %vm134_vm4 = vcmask 294080  }
  0x7d   :  { %38 = vst.msk [vmem:[#allocation0 + $0x8] sm:$0x1] %vm36_vm5, %v35_v29   ;;  %vm140_vm5 = vcmask 261280  }
  0x7e   :  { %44 = vst.msk [vmem:[#allocation0] sm:$0x1] %vm43_vm6, %v42_v31   ;;  %v48_v32 = vpop.permute.xlu0 %47   ;;  %vm147_vm6 = vcmask 228480  }
  0x7f   :  { %51 = vst.msk [vmem:[#allocation0 + $0x8] sm:$0x1] %vm49_vm7, %v48_v32   ;;  %vm154_vm7 = vcmask 195680  }
  0x80   :  { %57 = vst.msk [vmem:[#allocation0] sm:$0x1] %vm56_vm8, %v55_v33   ;;  %v68_v35 = vpop.permute.xlu1 %67   ;;  %vm160_vm8 = vcmask 162880  }
  0x81   :  { %70 = vst.msk [vmem:[#allocation0] sm:$0x1] %vm69_vm10, %v68_v35  }
  0x82   :  { %v61_v34 = vpop.permute.xlu0 %60  }
  0x83   :  { %64 = vst.msk [vmem:[#allocation0 + $0x8] sm:$0x1] %vm62_vm9, %v61_v34   ;;  %vm167_vm9 = vcmask 130080  }
  0x84   :  { %v81_v37 = vpop.permute.xlu1 %80  }
  0x85   :  { %83 = vst.msk [vmem:[#allocation0] sm:$0x1] %vm82_vm12, %v81_v37  }
  0x86   :  { %v74_v36 = vpop.permute.xlu0 %73  }
  0x87   :  { %77 = vst.msk [vmem:[#allocation0 + $0x8] sm:$0x1] %vm75_vm11, %v74_v36  }
  0x88   :  { %v94_v39 = vpop.permute.xlu1 %93  }
  0x89   :  { %96 = vst.msk [vmem:[#allocation0] sm:$0x1] %vm95_vm14, %v94_v39  }
  0x8a   :  { %v87_v38 = vpop.permute.xlu0 %86  }
  0x8b   :  { %90 = vst.msk [vmem:[#allocation0 + $0x8] sm:$0x1] %vm88_vm13, %v87_v38  }
  0x8c   :  { %v107_v41 = vpop.permute.xlu1 %106  }
  0x8d   :  { %109 = vst.msk [vmem:[#allocation0] sm:$0x1] %vm108_vm0, %v107_v41  }
  0x8e   :  { %v100_v40 = vpop.permute.xlu0 %99  }
  0x8f   :  { %103 = vst.msk [vmem:[#allocation0 + $0x8] sm:$0x1] %vm101_vm15, %v100_v40  }
  0x90   :  { %v120_v43 = vpop.permute.xlu1 %119  }
  0x91   :  { %122 = vst.msk [vmem:[#allocation0] sm:$0x1] %vm121_vm2, %v120_v43  }
  0x92   :  { %v113_v42 = vpop.permute.xlu0 %112  }
  0x93   :  { %116 = vst.msk [vmem:[#allocation0 + $0x8] sm:$0x1] %vm114_vm1, %v113_v42  }
  0x94   :  { %v133_v45 = vpop.permute.xlu1 %132  }
  0x95   :  { %135 = vst.msk [vmem:[#allocation0] sm:$0x1] %vm134_vm4, %v133_v45  }
  0x96   :  { %v126_v44 = vpop.permute.xlu0 %125  }
  0x97   :  { %129 = vst.msk [vmem:[#allocation0 + $0x8] sm:$0x1] %vm127_vm3, %v126_v44  }
  0x98   :  { %v146_v47 = vpop.permute.xlu1 %145  }
  0x99   :  { %149 = vst.msk [vmem:[#allocation0 + $0x8] sm:$0x1] %vm147_vm6, %v146_v47  }
  0x9a   :  { %v139_v46 = vpop.permute.xlu0 %138  }
  0x9b   :  { %142 = vst.msk [vmem:[#allocation0 + $0x10] sm:$0x1] %vm140_vm5, %v139_v46  }
  0x9c   :  { %v159_v49 = vpop.permute.xlu1 %158  }
  0x9d   :  { %162 = vst.msk [vmem:[#allocation0 + $0x10] sm:$0x1] %vm160_vm8, %v159_v49  }
  0x9e   :  { %v153_v48 = vpop.permute.xlu0 %152  }
  0x9f   :  { %155 = vst.msk [vmem:[#allocation0] sm:$0x1] %vm154_vm7, %v153_v48  }
  0xa2   :  { %v166_v50 = vpop.permute.xlu0 %165  }
  0xa3   :  { %169 = vst.msk [vmem:[#allocation0 + $0x8] sm:$0x1] %vm167_vm9, %v166_v50  }
  0xa4   :  { %v185_v52 = vld [vmem:[#allocation0 + $0x10] sm:$0x1] }
  0xa5   :  { %218 = vst [vmem:[%s367_s1 + $0x2] sm:$0x1] %v185_v52 }
  0xa6   :  { %v174_v51 = vld [vmem:[#allocation0] sm:$0x1] }
  0xa7   :  { %177 = vst [vmem:[%s367_s1] sm:$0x1] %v174_v51 }
  0xaa   :  { %v179_v53 = vld [vmem:[#allocation0 + $0x8] sm:$0x1] }
  0xab   :  { %217 = vst [vmem:[%s367_s1 + $0x1] sm:$0x1] %v179_v53 }

// kernel: tile.18
= control target key start
LH: loop header
LB: loop body
LE: loop exit
PB: predicated region body
PF: predicated region fallthrough
CT: control target
= control target key end

     0   :  { %s22_s0 = inlined_call_operand.vmem [shape: f32[64], index: 0, kind: input, shape index: {}]   ;;  %s23_s1 = inlined_call_operand.vmem [shape: f32[8,64], index: 1, kind: output, shape index: {}]  }
   0x1   :  { %v4_v0 = vld [vmem:[%s22_s0] ss:$0 sm:$0xff] }
   0x2   :  { %5 = vst [vmem:[%s23_s1] sm:$0xff] %v4_v0 }

// kernel: tile.19
= control target key start
LH: loop header
LB: loop body
LE: loop exit
PB: predicated region body
PF: predicated region fallthrough
CT: control target
= control target key end

     0   :  { %vm3_vm0 = vcmask 523264   ;;  %s46_s8 = smov 64   ;;  %vm9_vm1 = vcmask 1048064   ;;  %s75_s0 = inlined_call_operand.vmem [shape: f32[8,64], index: 0, kind: input, shape index: {}]   ;;  %s76_s1 = inlined_call_operand.vmem [shape: f32[1,512], index: 1, kind: output, shape index: {}]  }
   0x1   :  { %v41_v0 = vld [vmem:[%s75_s0 + $0x1] ss:$2 sm:$0xf]   ;;  %v2_v1 = vld [vmem:[%s75_s0] ss:$2 sm:$0xf]  }
   0x2   :  { %7 = vrot.lane.b32.xlu0 %v41_v0, %s46_s8  ;;  %4 = vst.msk [vmem:[#allocation0] ss:$8 sm:$0xf] %vm3_vm0, %v2_v1  }
  0x74   :  { %v8_v2 = vpop.permute.xlu0 %7  }
  0x75   :  { %10 = vst.msk [vmem:[#allocation0] ss:$8 sm:$0xf] %vm9_vm1, %v8_v2  }
  0x7c   :  { %v15_v3 = vld [vmem:[#allocation0] sm:$0x1]  ;;  %v20_v4 = vld [vmem:[#allocation0 + $0x8] sm:$0x1]  ;;  %v26_v5 = vld [vmem:[#allocation0 + $0x10] sm:$0x1] }
  0x7d   :  { %18 = vst [vmem:[%s76_s1] sm:$0x1] %v15_v3  ;;  %42 = vst [vmem:[%s76_s1 + $0x1] sm:$0x1] %v20_v4  ;;  %v33_v6 = vld [vmem:[#allocation0 + $0x18] sm:$0x1] }
  0x7e   :  { %43 = vst [vmem:[%s76_s1 + $0x2] sm:$0x1] %v26_v5  ;;  %44 = vst [vmem:[%s76_s1 + $0x3] sm:$0x1] %v33_v6 }

// kernel: mnist_cnn_forward.1
= control target key start
LH: loop header
LB: loop body
LE: loop exit
PB: predicated region body
PF: predicated region fallthrough
CT: control target
= control target key end

     0   :  { %s3477_s24 = smov 0   ;;  %s5294_s0 = inlined_call_operand.vmem [shape: f32[2,28,28], index: 0, kind: input, shape index: {}]   ;;  %s5295_s1 = inlined_call_operand.vmem [shape: f32[5,28,288], index: 1, kind: input, shape index: {}]   ;;  %s5296_s2 = inlined_call_operand.vmem [shape: f32[1,288], index: 2, kind: input, shape index: {}]   ;;  %s5297_s3 = inlined_call_operand.vmem [shape: f32[288,144], index: 3, kind: input, shape index: {}]   ;;  %s5298_s4 = inlined_call_operand.vmem [shape: f32[12,24], index: 4, kind: input, shape index: {}]   ;;  %s5299_s5 = inlined_call_operand.vmem [shape: f32[5,144,512], index: 5, kind: input, shape index: {}]   ;;  %s5300_s6 = inlined_call_operand.vmem [shape: f32[1,512], index: 6, kind: input, shape index: {}]   ;;  %s5301_s7 = inlined_call_operand.vmem [shape: f32[2,8,512], index: 7, kind: output, shape index: {}]  }
   0x1 LB: > { %s2888_s25 = sadd.s32 4294967295, %s3433_s24   ;;  %p2892_p0 = scmp.ge.s32.totalorder %s3433_s24, 1  ;;  %s3433_s24 = sphi %s3477_s24, %s17_s24  }
   0x2   : > { %p237_p1 = scmp.lt.s32.totalorder %s3433_s24, 3 }
   0x4   : > { %p238_p2 = pnand %p2892_p0, %p237_p1 }
   0x5   : > { %p269_p3 = scmp.lt.s32.totalorder (!%p238_p2), %s2888_s25, 1 }
   0x6   : > { %241 = sbr.rel (%p238_p2) target bundleno = 1090 (0x442), region = 48 }
   0xb   : > { %v2907_v0 = vld [vmem:[%s5295_s1 + $0xb0] sm:$0xf]  ;;  %vm327_vm0 = vcmask 1043456   ;;  %v294_v1 = vld [vmem:[%s5295_s1 + $0x58] sm:$0xf]  ;;  %v3435_v2 = vmov 0.0  }
   0xc   : > { %3349 = vmatprep.subr.mxu1 %v3435_v2  ;;  %2909 = vmatprep.subr.msk.mxu0 %vm327_vm0, %v2907_v0  ;;  %v2906_v3 = vld [vmem:[%s5295_s1 + $0xa8] sm:$0xf]  ;;  %v2904_v4 = vld [vmem:[%s5295_s1 + $0x98] sm:$0xff]  ;;  %v291_v5 = vld [vmem:[%s5295_s1 + $0x40] sm:$0xff]  ;;  %s5303_s25 = smov (!%p269_p3, %s2888_s25), 1  ;;  %vm320_vm1 = vcmask 228352  }
   0xd   : > { %3350 = vmatpush3.msk.msra.mxu1 %vm327_vm0, %v294_v1  ;;  %2910 = vmatpush1.msk.msra.mxu0 %vm327_vm0, %v2906_v3  ;;  %v2903_v6 = vld [vmem:[%s5295_s1 + $0x90] sm:$0xff]  ;;  %v2901_v7 = vld [vmem:[%s5295_s1 + $0x80] sm:$0xff]  ;;  %v288_v8 = vld [vmem:[%s5295_s1 + $0x28] sm:$0xff]  ;;  %s3295_s27 = sshll.u32 %s5303_s25, 5  ;;  %vm312_vm2 = vcmask 1046528   ;;  %vm3436_vm3 = vmmov 0  }
   0xe   : > { %3351 = vmatprep.subr.mxu1 %v3435_v2  ;;  %363 = vmatprep.subr.mxu0 %v2904_v4  ;;  %v2900_v9 = vld [vmem:[%s5295_s1 + $0x78] sm:$0xff]  ;;  %v2898_v10 = vld [vmem:[%s5295_s1 + $0x68] sm:$0xff]  ;;  %v285_v11 = vld [vmem:[%s5295_s1 + $0x10] sm:$0xff]  ;;  %s273_s9 = scalar_lea.vmem %s5294_s0, %s3295_s27  ;;  %vm691_vm4 = vcmask 1045504   ;;  %vm899_vm5 = vcmask 1044480   ;;  %vm1408_vm6 = vcmask 261120   ;;  %s5282_s20 = scalar_lea.vmem %s5301_s7, %s3295_s27 }
   0xf   : > { %3352 = vmatpush3.msra.mxu1 %v291_v5  ;;  %364 = vmatpush1.msra.mxu0 %v2903_v6  ;;  %v2897_v12 = vld [vmem:[%s5295_s1 + $0x60] sm:$0xff]  ;;  %v3538_v14 = vld [vmem:[%s273_s9 + $0x8] sm:$0xff]  ;;  %v3540_v15 = vld [vmem:[%s273_s9 + $0x10] sm:$0xff]  ;;  %vm1586_vm7 = vcmask 195584   ;;  %vm1826_vm8 = vcmask 130048  }
  0x10   : > { %3353 = vmatprep.subr.mxu1 %v3435_v2  ;;  %365 = vmatprep.subr.mxu0 %v2901_v7  ;;  %v3536_v13 = vld [vmem:[%s273_s9] sm:$0xff]  ;;  %v314_v17 = vrot.slane %v3538_v14, 1  ;;  %v316_v18 = vrot.slane %v3540_v15, 1  ;;  %v3548_v19 = vld [vmem:[%s273_s9 + $0x18] sm:$0xf]  ;;  %v2932_v28 = vld [vmem:[%s5295_s1 + $0xe8] sm:$0xff] }
  0x11   : > { %3354 = vmatpush3.msra.mxu1 %v288_v8  ;;  %366 = vmatpush1.msra.mxu0 %v2900_v9  ;;  %v313_v16 = vrot.slane %v3536_v13, 1  ;;  %v2938_v21 = vld [vmem:[%s5295_s1 + $0x118] sm:$0xf]  ;;  %v318_v24 = vrot.slane %v3548_v19, 1  ;;  %v2935_v25 = vld [vmem:[%s5295_s1 + $0x100] sm:$0xff]  ;;  %v2902_v29 = vld [vmem:[%s5295_s1 + $0x88] sm:$0xff] }
  0x12   : > { %3355 = vmatprep.subr.mxu1 %v3435_v2  ;;  %367 = vmatprep.subr.mxu0 %v2898_v10  ;;  %v2908_v22 = vld [vmem:[%s5295_s1 + $0xb8] sm:$0xf]  ;;  %v317_v23 = vsel %vm312_vm2, %v314_v17, %v316_v18  ;;  %v2905_v26 = vld [vmem:[%s5295_s1 + $0xa0] sm:$0xff]  ;;  %v692_v30 = vrot.slane %v3536_v13, 2  ;;  %v693_v31 = vrot.slane %v3538_v14, 2  ;;  %v2929_v32 = vld [vmem:[%s5295_s1 + $0xd0] sm:$0xff] }
  0x13   : > { %3356 = vmatpush3.msra.mxu1 %v285_v11  ;;  %3357 = vmatprep.mubr.msk.f32.mxu1 %vm3436_vm3, %v3435_v2  ;;  %v315_v20 = vsel %vm312_vm2, %v313_v16, %v314_v17  ;;  %v319_v27 = vsel %vm312_vm2, %v316_v18, %v318_v24  ;;  %v2899_v33 = vld [vmem:[%s5295_s1 + $0x70] sm:$0xff]  ;;  %v695_v35 = vrot.slane %v3540_v15, 2  ;;  %v2959_v37 = vld [vmem:[%s5295_s1 + $0x178] sm:$0xf]  ;;  %v292_v38 = vld [vmem:[%s5295_s1 + $0x48] sm:$0xf] }
  0x14   : > { %368 = vmatpush1.msra.mxu0 %v2897_v12  ;;  %401 = vmatprep.mubr.f32.mxu0 %v3435_v2  ;;  %v3606_v34 = vsel %vm691_vm4, %v692_v30, %v693_v31  ;;  %v293_v36 = vld [vmem:[%s5295_s1 + $0x50] sm:$0xf]  ;;  %v697_v40 = vrot.slane %v3548_v19, 2  ;;  %v290_v41 = vld [vmem:[%s5295_s1 + $0x38] sm:$0xff]  ;;  %v2956_v42 = vld [vmem:[%s5295_s1 + $0x160] sm:$0xff]  ;;  %v900_v48 = vrot.slane %v3536_v13, 3 }
  0x15   : > { %3358 = vmatmul.mubr.msk.f32.vlgmr.msra.gmra.mxu1 %vm320_vm1, %v3536_v13  ;;  %3366 = vmatprep.subr.mxu1 %v3435_v2  ;;  %v3630_v39 = vsel %vm691_vm4, %v693_v31, %v695_v35  ;;  %v289_v43 = vld [vmem:[%s5295_s1 + $0x30] sm:$0xff]  ;;  %v287_v45 = vld [vmem:[%s5295_s1 + $0x20] sm:$0xff]  ;;  %v2953_v46 = vld [vmem:[%s5295_s1 + $0x148] sm:$0xff]  ;;  %v901_v49 = vrot.slane %v3538_v14, 3  ;;  %v903_v54 = vrot.slane %v3540_v15, 3  ;;  %v905_v59 = vrot.slane %v3548_v19, 3 }
  0x16   : > { %2911 = vmatmul.mubr.msk.f32.vlgmr.msra.gmra.mxu0 %vm320_vm1, %v315_v20  ;;  %3360 = vmatprep.mubr.msk.f32.mxu1 %vm3436_vm3, %v3435_v2  ;;  %v3651_v44 = vsel %vm691_vm4, %v695_v35, %v697_v40  ;;  %v286_v47 = vld [vmem:[%s5295_s1 + $0x18] sm:$0xff]  ;;  %v284_v50 = vld [vmem:[%s5295_s1 + $0x8] sm:$0xff]  ;;  %v2950_v51 = vld [vmem:[%s5295_s1 + $0x130] sm:$0xff]  ;;  %v1107_v4 = vrot.slane %v3536_v13, 4  ;;  %v1108_v5 = vrot.slane %v3538_v14, 4  ;;  %v1110_v10 = vrot.slane %v3540_v15, 4 }
  0x17   : > { %407 = vmatprep.mubr.f32.mxu0 %v3435_v2  ;;  %3332 = vmatprep.subr.mxu0 %v3435_v2  ;;  %v283_v52 = vld [vmem:[%s5295_s1] sm:$0xff]  ;;  %v3683_v53 = vsel %vm899_vm5, %v900_v48, %v901_v49  ;;  %v2937_v55 = vld [vmem:[%s5295_s1 + $0x110] sm:$0xf]  ;;  %v2980_v56 = vld [vmem:[%s5295_s1 + $0x1d8] sm:$0xf]  ;;  %v3706_v58 = vsel %vm899_vm5, %v901_v49, %v903_v54  ;;  %v3728_v63 = vsel %vm899_vm5, %v903_v54, %v905_v59 }
  0x18   : > { %3367 = vmatpush3.msk.msra.mxu1 %vm327_vm0, %v2938_v21  ;;  %3333 = vmatpush3.msk.msra.mxu0 %vm327_vm0, %v2908_v22  ;;  %v2936_v57 = vld [vmem:[%s5295_s1 + $0x108] sm:$0xf]  ;;  %v2934_v60 = vld [vmem:[%s5295_s1 + $0xf8] sm:$0xff]  ;;  %v2977_v61 = vld [vmem:[%s5295_s1 + $0x1c0] sm:$0xff]  ;;  %v1109_v9 = vsel %vm327_vm0, %v1107_v4, %v1108_v5 }
  0x19   : > { %3361 = vmatmul.mubr.msk.f32.gmra.mxu1 %vm320_vm1, %v3538_v14  ;;  %3368 = vmatprep.subr.mxu1 %v3435_v2  ;;  %v2933_v62 = vld [vmem:[%s5295_s1 + $0xf0] sm:$0xff]  ;;  %v2931_v0 = vld [vmem:[%s5295_s1 + $0xe0] sm:$0xff]  ;;  %v2974_v1 = vld [vmem:[%s5295_s1 + $0x1a8] sm:$0xff] }
  0x1a   : > { %2912 = vmatmul.mubr.msk.f32.gmra.mxu0 %vm320_vm1, %v317_v23  ;;  %3334 = vmatprep.subr.mxu0 %v3435_v2  ;;  %v2930_v3 = vld [vmem:[%s5295_s1 + $0xd8] sm:$0xff]  ;;  %v2928_v6 = vld [vmem:[%s5295_s1 + $0xc8] sm:$0xff]  ;;  %v2971_v7 = vld [vmem:[%s5295_s1 + $0x190] sm:$0xff] }
  0x1b   : > { %3363 = vmatprep.mubr.msk.f32.mxu1 %vm3436_vm3, %v3435_v2  ;;  %3369 = vmatpush3.msra.mxu1 %v2935_v25  ;;  %v2927_v8 = vld [vmem:[%s5295_s1 + $0xc0] sm:$0xff]  ;;  %v2958_v11 = vld [vmem:[%s5295_s1 + $0x170] sm:$0xf]  ;;  %v2957_v12 = vld [vmem:[%s5295_s1 + $0x168] sm:$0xf] }
  0x1c   : > { %413 = vmatprep.mubr.f32.mxu0 %v3435_v2  ;;  %3335 = vmatpush3.msra.mxu0 %v2905_v26  ;;  %v2954_v16 = vld [vmem:[%s5295_s1 + $0x150] sm:$0xff]  ;;  %v2952_v17 = vld [vmem:[%s5295_s1 + $0x140] sm:$0xff]  ;;  %v2976_v24 = vld [vmem:[%s5295_s1 + $0x1b8] sm:$0xff] }
  0x1d   : > { %3364 = vmatmul.mubr.msk.f32.gmra.mxu1 %vm320_vm1, %v3540_v15  ;;  %3370 = vmatprep.subr.mxu1 %v3435_v2  ;;  %v2948_v21 = vld [vmem:[%s5295_s1 + $0x120] sm:$0xff]  ;;  %v2979_v22 = vld [vmem:[%s5295_s1 + $0x1d0] sm:$0xf]  ;;  %v1367_v30 = vld [vmem:[%s5297_s3 + $0xf8] sm:$0xff] }
  0x1e   : > { %2913 = vmatmul.mubr.msk.f32.gmra.mxu0 %vm320_vm1, %v319_v27  ;;  %3336 = vmatprep.subr.mxu0 %v3435_v2  ;;  %v2975_v25 = vld [vmem:[%s5295_s1 + $0x1b0] sm:$0xff]  ;;  %v2973_v26 = vld [vmem:[%s5295_s1 + $0x1a0] sm:$0xff]  ;;  %v1357_v40 = vld [vmem:[%s5297_s3 + $0xa8] sm:$0xff] }
  0x1f   : > { %3371 = vmatpush3.msra.mxu1 %v2932_v28  ;;  %3337 = vmatpush3.msra.mxu0 %v2902_v29  ;;  %v2970_v28 = vld [vmem:[%s5295_s1 + $0x188] sm:$0xff]  ;;  %v2969_v29 = vld [vmem:[%s5295_s1 + $0x180] sm:$0xff]  ;;  %v1366_v31 = vld [vmem:[%s5297_s3 + $0xf0] sm:$0xff] }
  0x20   : > { %3372 = vmatprep.subr.mxu1 %v3435_v2  ;;  %3338 = vmatprep.subr.mxu0 %v3435_v2  ;;  %v1362_v35 = vld [vmem:[%s5297_s3 + $0xd0] sm:$0xff]  ;;  %v1349_v48 = vld [vmem:[%s5297_s3 + $0x68] sm:$0xff]  ;;  %v1348_v49 = vld [vmem:[%s5297_s3 + $0x60] sm:$0xff] }
  0x21   : > { %3373 = vmatpush3.msra.mxu1 %v2929_v32  ;;  %3374 = vmatprep.mubr.msk.f32.mxu1 %vm3436_vm3, %v3435_v2  ;;  %v1365_v32 = vld [vmem:[%s5297_s3 + $0xe8] sm:$0xff]  ;;  %v1343_v54 = vld [vmem:[%s5297_s3 + $0x38] sm:$0xff] }
  0x22   : > { %3339 = vmatpush3.msra.mxu0 %v2899_v33  ;;  %3340 = vmatprep.mubr.msk.f32.mxu0 %vm3436_vm3, %v3435_v2  ;;  %v1364_v33 = vld [vmem:[%s5297_s3 + $0xe0] sm:$0xff]  ;;  %v1407_v59 = vld [vmem:[%s5297_s3 + $0x238] sm:$0xff] }
  0x23   : > { %3375 = vmatmul.mubr.msk.f32.vlgmr.msra.gmra.mxu1 %vm320_vm1, %v3606_v34  ;;  %3341 = vmatmul.mubr.msk.f32.vlgmr.msra.gmra.mxu0 %vm320_vm1, %v315_v20  ;;  %v2949_v20 = vld [vmem:[%s5295_s1 + $0x128] sm:$0xff]  ;;  %v1403_v4 = vld [vmem:[%s5297_s3 + $0x218] sm:$0xff] }
  0x24   : > { %3377 = vmatprep.mubr.msk.f32.mxu1 %vm3436_vm3, %v3435_v2  ;;  %3343 = vmatprep.mubr.msk.f32.mxu0 %vm3436_vm3, %v3435_v2 }
  0x25   : > { %3383 = vmatprep.subr.mxu1 %v3435_v2  ;;  %2918 = vmatprep.subr.msk.mxu0 %vm327_vm0, %v293_v36  ;;  %v1361_v36 = vld [vmem:[%s5297_s3 + $0xc8] sm:$0xff] }
  0x26   : > { %3384 = vmatpush3.msk.msra.mxu1 %vm327_vm0, %v2959_v37  ;;  %2919 = vmatpush1.msk.msra.mxu0 %vm327_vm0, %v292_v38  ;;  %v1360_v37 = vld [vmem:[%s5297_s3 + $0xc0] sm:$0xff]  ;;  %v1359_v38 = vld [vmem:[%s5297_s3 + $0xb8] sm:$0xff] }
  0x27   : > { %3378 = vmatmul.mubr.msk.f32.gmra.mxu1 %vm320_vm1, %v3630_v39  ;;  %3344 = vmatmul.mubr.msk.f32.gmra.mxu0 %vm320_vm1, %v317_v23  ;;  %v2978_v23 = vld [vmem:[%s5295_s1 + $0x1c8] sm:$0xf] }
  0x28   : > { %3385 = vmatprep.subr.mxu1 %v3435_v2  ;;  %541 = vmatprep.subr.mxu0 %v290_v41  ;;  %v1356_v41 = vld [vmem:[%s5297_s3 + $0xa0] sm:$0xff] }
  0x29   : > { %3380 = vmatprep.mubr.msk.f32.mxu1 %vm3436_vm3, %v3435_v2  ;;  %3386 = vmatpush3.msra.mxu1 %v2956_v42  ;;  %v1355_v42 = vld [vmem:[%s5297_s3 + $0x98] sm:$0xff] }
  0x2a   : > { %3346 = vmatprep.mubr.msk.f32.mxu0 %vm3436_vm3, %v3435_v2  ;;  %542 = vmatpush1.msra.mxu0 %v289_v43  ;;  %v1354_v43 = vld [vmem:[%s5297_s3 + $0x90] sm:$0xff] }
  0x2b   : > { %3381 = vmatmul.mubr.msk.f32.gmra.mxu1 %vm320_vm1, %v3651_v44  ;;  %3387 = vmatprep.subr.mxu1 %v3435_v2 }
  0x2c   : > { %3347 = vmatmul.mubr.msk.f32.gmra.mxu0 %vm320_vm1, %v319_v27  ;;  %543 = vmatprep.subr.mxu0 %v287_v45  ;;  %v2972_v27 = vld [vmem:[%s5295_s1 + $0x198] sm:$0xff]  ;;  %v1352_v45 = vld [vmem:[%s5297_s3 + $0x80] sm:$0xff] }
  0x2d   : > { %3388 = vmatpush3.msra.mxu1 %v2953_v46  ;;  %544 = vmatpush1.msra.mxu0 %v286_v47  ;;  %v1351_v46 = vld [vmem:[%s5297_s3 + $0x78] sm:$0xff]  ;;  %v1350_v47 = vld [vmem:[%s5297_s3 + $0x70] sm:$0xff] }
  0x2e   : > { %3389 = vmatprep.subr.mxu1 %v3435_v2  ;;  %545 = vmatprep.subr.mxu0 %v284_v50  ;;  %v1347_v50 = vld [vmem:[%s5297_s3 + $0x58] sm:$0xff] }
  0x2f   : > { %3390 = vmatpush3.msra.mxu1 %v2950_v51  ;;  %3391 = vmatprep.mubr.msk.f32.mxu1 %vm3436_vm3, %v3435_v2  ;;  %v1346_v51 = vld [vmem:[%s5297_s3 + $0x50] sm:$0xff] }
  0x30   : > { %546 = vmatpush1.msra.mxu0 %v283_v52  ;;  %579 = vmatprep.mubr.f32.mxu0 %v3435_v2  ;;  %v1345_v52 = vld [vmem:[%s5297_s3 + $0x48] sm:$0xff] }
  0x31   : > { %3392 = vmatmul.mubr.msk.f32.vlgmr.msra.gmra.mxu1 %vm320_vm1, %v3683_v53  ;;  %2920 = vmatmul.mubr.msk.f32.vlgmr.msra.gmra.mxu0 %vm320_vm1, %v3536_v13  ;;  %v1111_v13 = vsel %vm327_vm0, %v1108_v5, %v1110_v10  ;;  %v1398_v5 = vld [vmem:[%s5297_s3 + $0x1f0] sm:$0xff] }
  0x32   : > { %3394 = vmatprep.mubr.msk.f32.mxu1 %vm3436_vm3, %v3435_v2  ;;  %585 = vmatprep.mubr.f32.mxu0 %v3435_v2 }
  0x33   : > { %3400 = vmatprep.subr.mxu1 %v3435_v2  ;;  %2939 = vmatprep.subr.msk.mxu0 %vm327_vm0, %v2937_v55  ;;  %v1342_v55 = vld [vmem:[%s5297_s3 + $0x30] sm:$0xff] }
  0x34   : > { %3401 = vmatpush3.msk.msra.mxu1 %vm327_vm0, %v2980_v56  ;;  %2940 = vmatpush1.msk.msra.mxu0 %vm327_vm0, %v2936_v57  ;;  %v1341_v56 = vld [vmem:[%s5297_s3 + $0x28] sm:$0xff]  ;;  %v1340_v57 = vld [vmem:[%s5297_s3 + $0x20] sm:$0xff] }
  0x35   : > { %3395 = vmatmul.mubr.msk.f32.gmra.mxu1 %vm320_vm1, %v3706_v58  ;;  %2921 = vmatmul.mubr.msk.f32.gmra.mxu0 %vm320_vm1, %v3538_v14  ;;  %v1112_v14 = vrot.slane %v3548_v19, 4  ;;  %v2951_v19 = vld [vmem:[%s5295_s1 + $0x138] sm:$0xff] }
  0x36   : > { %3402 = vmatprep.subr.mxu1 %v3435_v2  ;;  %740 = vmatprep.subr.mxu0 %v2934_v60  ;;  %v1338_v60 = vld [vmem:[%s5297_s3 + $0x10] sm:$0xff] }
  0x37   : > { %3397 = vmatprep.mubr.msk.f32.mxu1 %vm3436_vm3, %v3435_v2  ;;  %3403 = vmatpush3.msra.mxu1 %v2977_v61  ;;  %v1113_v18 = vsel %vm327_vm0, %v1110_v10, %v1112_v14  ;;  %v1406_v61 = vld [vmem:[%s5297_s3 + $0x230] sm:$0xff]  ;;  %v1400_v10 = vld [vmem:[%s5297_s3 + $0x200] sm:$0xff] }
  0x38   : > { %591 = vmatprep.mubr.f32.mxu0 %v3435_v2  ;;  %741 = vmatpush1.msra.mxu0 %v2933_v62  ;;  %v1337_v62 = vld [vmem:[%s5297_s3 + $0x8] sm:$0xff]  ;;  %v1392_v14 = vld [vmem:[%s5297_s3 + $0x1c0] sm:$0xff] }
  0x39   : > { %3398 = vmatmul.mubr.msk.f32.gmra.mxu1 %vm320_vm1, %v3728_v63  ;;  %3404 = vmatprep.subr.mxu1 %v3435_v2 }
  0x3a   : > { %2922 = vmatmul.mubr.msk.f32.gmra.mxu0 %vm320_vm1, %v3540_v15  ;;  %742 = vmatprep.subr.mxu0 %v2931_v0  ;;  %v2955_v15 = vld [vmem:[%s5295_s1 + $0x158] sm:$0xff]  ;;  %v1336_v0 = vld [vmem:[%s5297_s3] sm:$0xff] }
  0x3b   : > { %3405 = vmatpush3.msra.mxu1 %v2974_v1  ;;  %743 = vmatpush1.msra.mxu0 %v2930_v3  ;;  %v1404_v1 = vld [vmem:[%s5297_s3 + $0x220] sm:$0xff]  ;;  %v1399_v3 = vld [vmem:[%s5297_s3 + $0x1f8] sm:$0xff] }
  0x3c   : > { %3406 = vmatprep.subr.mxu1 %v3435_v2  ;;  %744 = vmatprep.subr.mxu0 %v2928_v6  ;;  %v1402_v6 = vld [vmem:[%s5297_s3 + $0x210] sm:$0xff] }
  0x3d   : > { %3407 = vmatpush3.msra.mxu1 %v2971_v7  ;;  %3408 = vmatprep.mubr.msk.f32.mxu1 %vm3436_vm3, %v3435_v2  ;;  %v1397_v7 = vld [vmem:[%s5297_s3 + $0x1e8] sm:$0xff] }
  0x3e   : > { %745 = vmatpush1.msra.mxu0 %v2927_v8  ;;  %778 = vmatprep.mubr.f32.mxu0 %v3435_v2  ;;  %v1401_v8 = vld [vmem:[%s5297_s3 + $0x208] sm:$0xff] }
  0x3f   : > { %3409 = vmatmul.mubr.msk.f32.vlgmr.msra.gmra.mxu1 %vm320_vm1, %v1109_v9  ;;  %2941 = vmatmul.mubr.msk.f32.vlgmr.msra.gmra.mxu0 %vm320_vm1, %v3606_v34  ;;  %v1363_v34 = vld [vmem:[%s5297_s3 + $0xd8] sm:$0xff] }
  0x40   : > { %3411 = vmatprep.mubr.msk.f32.mxu1 %vm3436_vm3, %v3435_v2  ;;  %784 = vmatprep.mubr.f32.mxu0 %v3435_v2 }
  0x41   : > { %2960 = vmatprep.subr.msk.mxu0 %vm327_vm0, %v2958_v11  ;;  %1525 = vmatprep.subr.mxu1 %v1407_v59  ;;  %v1395_v11 = vld [vmem:[%s5297_s3 + $0x1d8] sm:$0xff] }
  0x42   : > { %2961 = vmatpush1.msk.msra.mxu0 %vm327_vm0, %v2957_v12  ;;  %1526 = vmatpush1.msra.mxu1 %v1406_v61  ;;  %v1394_v12 = vld [vmem:[%s5297_s3 + $0x1d0] sm:$0xff] }
  0x43   : > { %3412 = vmatmul.mubr.msk.f32.gmra.mxu1 %vm320_vm1, %v1111_v13  ;;  %2942 = vmatmul.mubr.msk.f32.gmra.mxu0 %vm320_vm1, %v3630_v39  ;;  %v1358_v39 = vld [vmem:[%s5297_s3 + $0xb0] sm:$0xff] }
  0x44   : > { %948 = vmatprep.subr.mxu0 %v2955_v15  ;;  %3414 = vmatprep.mubr.msk.f32.mxu1 %vm3436_vm3, %v3435_v2  ;;  %v1391_v15 = vld [vmem:[%s5297_s3 + $0x1b8] sm:$0xff] }
  0x45   : > { %790 = vmatprep.mubr.f32.mxu0 %v3435_v2  ;;  %949 = vmatpush1.msra.mxu0 %v2954_v16  ;;  %v1390_v16 = vld [vmem:[%s5297_s3 + $0x1b0] sm:$0xff] }
  0x46   : > { %950 = vmatprep.subr.mxu0 %v2952_v17  ;;  %v1389_v17 = vld [vmem:[%s5297_s3 + $0x1a8] sm:$0xff] }
  0x47   : > { %3415 = vmatmul.mubr.msk.f32.gmra.mxu1 %vm320_vm1, %v1113_v18  ;;  %2943 = vmatmul.mubr.msk.f32.gmra.mxu0 %vm320_vm1, %v3651_v44  ;;  %v1353_v44 = vld [vmem:[%s5297_s3 + $0x88] sm:$0xff] }
  0x48   : > { %951 = vmatpush1.msra.mxu0 %v2951_v19  ;;  %986 = vmatprep.mubr.f32.mxu0 %v3435_v2  ;;  %v1387_v19 = vld [vmem:[%s5297_s3 + $0x198] sm:$0xff] }
  0x49   : > { %952 = vmatprep.subr.mxu0 %v2949_v20  ;;  %1565 = vmatprep.mubr.f32.mxu1 %v3435_v2  ;;  %v1386_v20 = vld [vmem:[%s5297_s3 + $0x190] sm:$0xff] }
  0x4a   : > { %953 = vmatpush1.msra.mxu0 %v2948_v21  ;;  %v1385_v21 = vld [vmem:[%s5297_s3 + $0x188] sm:$0xff] }
  0x4b   : > { %2962 = vmatmul.mubr.msk.f32.vlgmr.msra.gmra.mxu0 %vm320_vm1, %v3683_v53  ;;  %2981 = vmatprep.subr.msk.mxu0 %vm327_vm0, %v2979_v22  ;;  %v1344_v53 = vld [vmem:[%s5297_s3 + $0x40] sm:$0xff] }
  0x4c   : > { %992 = vmatprep.mubr.f32.mxu0 %v3435_v2  ;;  %2982 = vmatpush1.msk.msra.mxu0 %vm327_vm0, %v2978_v23  ;;  %v1384_v22 = vld [vmem:[%s5297_s3 + $0x180] sm:$0xff]  ;;  %v1383_v23 = vld [vmem:[%s5297_s3 + $0x178] sm:$0xff] }
  0x4d   : > { %1155 = vmatprep.subr.mxu0 %v2976_v24  ;;  %v1382_v24 = vld [vmem:[%s5297_s3 + $0x170] sm:$0xff] }
  0x4e   : > { %1156 = vmatpush1.msra.mxu0 %v2975_v25  ;;  %v1381_v25 = vld [vmem:[%s5297_s3 + $0x168] sm:$0xff] }
  0x4f   : > { %2963 = vmatmul.mubr.msk.f32.gmra.mxu0 %vm320_vm1, %v3706_v58  ;;  %1157 = vmatprep.subr.mxu0 %v2973_v26  ;;  %v1339_v58 = vld [vmem:[%s5297_s3 + $0x18] sm:$0xff]  ;;  %v1380_v26 = vld [vmem:[%s5297_s3 + $0x160] sm:$0xff] }
  0x50   : > { %998 = vmatprep.mubr.f32.mxu0 %v3435_v2  ;;  %1158 = vmatpush1.msra.mxu0 %v2972_v27  ;;  %v1379_v27 = vld [vmem:[%s5297_s3 + $0x158] sm:$0xff] }
  0x51   : > { %1159 = vmatprep.subr.mxu0 %v2970_v28  ;;  %v1378_v28 = vld [vmem:[%s5297_s3 + $0x150] sm:$0xff] }
  0x52   : > { %1160 = vmatpush1.msra.mxu0 %v2969_v29  ;;  %v1377_v29 = vld [vmem:[%s5297_s3 + $0x148] sm:$0xff] }
  0x53   : > { %2964 = vmatmul.mubr.msk.f32.gmra.mxu0 %vm320_vm1, %v3728_v63  ;;  %1418 = vmatprep.subr.mxu0 %v1367_v30  ;;  %v1405_v63 = vld [vmem:[%s5297_s3 + $0x228] sm:$0xff]  ;;  %v1376_v30 = vld [vmem:[%s5297_s3 + $0x140] sm:$0xff] }
  0x54   : > { %1193 = vmatprep.mubr.f32.mxu0 %v3435_v2  ;;  %1527 = vmatprep.subr.mxu1 %v1405_v63 }
  0x55   : > { %1528 = vmatpush1.msra.mxu1 %v1404_v1  ;;  %v1303_v1 = vlaneseq }
  0x56   : > { %1529 = vmatprep.subr.mxu1 %v1403_v4 }
  0x57   : > { %2983 = vmatmul.mubr.msk.f32.vlgmr.msra.gmra.mxu0 %vm320_vm1, %v1109_v9  ;;  %1530 = vmatpush1.msra.mxu1 %v1402_v6  ;;  %v1396_v9 = vld [vmem:[%s5297_s3 + $0x1e0] sm:$0xff] }
  0x58   : > { %1199 = vmatprep.mubr.f32.mxu0 %v3435_v2  ;;  %1419 = vmatpush1.msra.mxu0 %v1366_v31  ;;  %v1375_v31 = vld [vmem:[%s5297_s3 + $0x138] sm:$0xff] }
  0x59   : > { %1420 = vmatprep.subr.mxu0 %v1365_v32  ;;  %1531 = vmatprep.subr.mxu1 %v1401_v8  ;;  %v1374_v32 = vld [vmem:[%s5297_s3 + $0x130] sm:$0xff] }
  0x5a   : > { %1421 = vmatpush1.msra.mxu0 %v1364_v33  ;;  %1532 = vmatpush1.msra.mxu1 %v1400_v10  ;;  %v1373_v33 = vld [vmem:[%s5297_s3 + $0x128] sm:$0xff] }
  0x5b   : > { %2984 = vmatmul.mubr.msk.f32.gmra.mxu0 %vm320_vm1, %v1111_v13  ;;  %1422 = vmatprep.subr.mxu0 %v1363_v34  ;;  %v1393_v13 = vld [vmem:[%s5297_s3 + $0x1c8] sm:$0xff]  ;;  %v1372_v34 = vld [vmem:[%s5297_s3 + $0x120] sm:$0xff] }
  0x5c   : > { %1205 = vmatprep.mubr.f32.mxu0 %v3435_v2  ;;  %1423 = vmatpush1.msra.mxu0 %v1362_v35  ;;  %v1371_v35 = vld [vmem:[%s5297_s3 + $0x118] sm:$0xff] }
  0x5d   : > { %1424 = vmatprep.subr.mxu0 %v1361_v36  ;;  %v1370_v36 = vld [vmem:[%s5297_s3 + $0x110] sm:$0xff] }
  0x5e   : > { %1425 = vmatpush1.msra.mxu0 %v1360_v37  ;;  %v1369_v37 = vld [vmem:[%s5297_s3 + $0x108] sm:$0xff] }
  0x5f   : > { %2985 = vmatmul.mubr.msk.f32.gmra.mxu0 %vm320_vm1, %v1113_v18  ;;  %1426 = vmatprep.subr.mxu0 %v1359_v38  ;;  %v1388_v18 = vld [vmem:[%s5297_s3 + $0x1a0] sm:$0xff] }
  0x60   : > { %1427 = vmatpush1.msra.mxu0 %v1358_v39  ;;  %v1368_v38 = vld [vmem:[%s5297_s3 + $0x100] sm:$0xff] }
  0x61   : > { %1428 = vmatprep.subr.mxu0 %v1357_v40 }
  0x62   : > { %1429 = vmatpush1.msra.mxu0 %v1356_v41 }
  0x63   : > { %1430 = vmatprep.subr.mxu0 %v1355_v42 }
  0x64   : > { %1431 = vmatpush1.msra.mxu0 %v1354_v43 }
  0x65   : > { %1432 = vmatprep.subr.mxu0 %v1353_v44 }
  0x66   : > { %1433 = vmatpush1.msra.mxu0 %v1352_v45 }
  0x67   : > { %1434 = vmatprep.subr.mxu0 %v1351_v46 }
  0x68   : > { %1435 = vmatpush1.msra.mxu0 %v1350_v47 }
  0x69   : > { %1436 = vmatprep.subr.mxu0 %v1349_v48 }
  0x6a   : > { %1437 = vmatpush1.msra.mxu0 %v1348_v49 }
  0x6b   : > { %1438 = vmatprep.subr.mxu0 %v1347_v50 }
  0x6c   : > { %1439 = vmatpush1.msra.mxu0 %v1346_v51 }
  0x6d   : > { %1440 = vmatprep.subr.mxu0 %v1345_v52 }
  0x6e   : > { %1441 = vmatpush1.msra.mxu0 %v1344_v53 }
  0x6f   : > { %1442 = vmatprep.subr.mxu0 %v1343_v54 }
  0x70   : > { %1443 = vmatpush1.msra.mxu0 %v1342_v55 }
  0x71   : > { %1444 = vmatprep.subr.mxu0 %v1341_v56 }
  0x72   : > { %1445 = vmatpush1.msra.mxu0 %v1340_v57 }
  0x73   : > { %1446 = vmatprep.subr.mxu0 %v1339_v58 }
  0x74   : > { %1447 = vmatpush1.msra.mxu0 %v1338_v60 }
  0x75   : > { %1448 = vmatprep.subr.mxu0 %v1337_v62 }
  0x76   : > { %1449 = vmatpush1.msra.mxu0 %v1336_v0 }
  0x77   : > { %1450 = vmatprep.subr.mxu0 %v1399_v3 }
  0x78   : > { %1451 = vmatpush2.msra.mxu0 %v1398_v5 }
  0x79   : > { %1452 = vmatprep.subr.mxu0 %v1397_v7  ;;  %v4078_v7 = vshrl.u32 %v1303_v1, 7 }
  0x7a   : > { %1453 = vmatpush2.msra.mxu0 %v1396_v9 }
  0x7b   : > { %1454 = vmatprep.subr.mxu0 %v1395_v11 }
  0x7c   : > { %1455 = vmatpush2.msra.mxu0 %v1394_v12 }
  0x7d   : > { %1456 = vmatprep.subr.mxu0 %v1393_v13  ;;  %v1313_v13 = vsub.s32 2, %v4078_v7 }
  0x7e   : > { %1457 = vmatpush2.msra.mxu0 %v1392_v14 }
  0x7f   : > { %1458 = vmatprep.subr.mxu0 %v1391_v15  ;;  %v1301_v15 = vld [vmem:[%s5296_s2] sm:$0x7] }
  0x80   : > { %1459 = vmatpush2.msra.mxu0 %v1390_v16 }
  0x81   : > { %1460 = vmatprep.subr.mxu0 %v1389_v17 }
  0x82   : > { %1461 = vmatpush2.msra.mxu0 %v1388_v18 }
  0x83   : > { %1462 = vmatprep.subr.mxu0 %v1387_v19 }
  0x84   : > { %1463 = vmatpush2.msra.mxu0 %v1386_v20  ;;  %v1314_v20 = vrot.slane %v1301_v15, %v1313_v13 }
  0x85   : > { %1464 = vmatprep.subr.mxu0 %v1385_v21 }
  0x86   : > { %1465 = vmatpush2.msra.mxu0 %v1384_v22 }
  0x87   : > { %1466 = vmatprep.subr.mxu0 %v1383_v23 }
  0x88   : > { %1467 = vmatpush2.msra.mxu0 %v1382_v24 }
  0x89   : > { %1468 = vmatprep.subr.mxu0 %v1381_v25 }
  0x8a   : > { %1469 = vmatpush2.msra.mxu0 %v1380_v26 }
  0x8b   : > { %1470 = vmatprep.subr.mxu0 %v1379_v27 }
  0x8c   : > { %1471 = vmatpush2.msra.mxu0 %v1378_v28 }
  0x8d   : > { %1472 = vmatprep.subr.mxu0 %v1377_v29 }
  0x8e   : > { %1473 = vmatpush2.msra.mxu0 %v1376_v30 }
  0x8f   : > { %1474 = vmatprep.subr.mxu0 %v1375_v31 }
  0x90   : > { %1475 = vmatpush2.msra.mxu0 %v1374_v32 }
  0x91   : > { %1476 = vmatprep.subr.mxu0 %v1373_v33 }
  0x92   : > { %1477 = vmatpush2.msra.mxu0 %v1372_v34 }
  0x93   : > { %1478 = vmatprep.subr.mxu0 %v1371_v35 }
  0x94   : > { %1479 = vmatpush2.msra.mxu0 %v1370_v36 }
  0x95   : > { %1480 = vmatprep.subr.mxu0 %v1369_v37 }
  0x96   : > { %1481 = vmatpush2.msra.mxu0 %v1368_v38 }
  0xd5   : > { %v664_v39 = vpop.f32.mrf.mxu1 }
  0xd6   : > { %v4066_v40 = vpop.f32.mrf.mxu0 }
  0xd7   : > { %v3359_v41 = vpop.f32.mrf.mxu1 }
  0xd8   : > { %v4068_v42 = vpop.f32.mrf.mxu0 }
  0xd9   : > { %v669_v43 = vpop.f32.mrf.mxu1 }
  0xda   : > { %v4070_v44 = vpop.f32.mrf.mxu0 }
  0xdb   : > { %v3362_v45 = vpop.f32.mrf.mxu1 }
  0xdc   : > { %v4072_v46 = vpop.f32.mrf.mxu0 }
  0xdd   : > { %v674_v47 = vpop.f32.mrf.mxu1 }
  0xde   : > { %v4074_v48 = vpop.f32.mrf.mxu0 }
  0xdf   : > { %v3365_v49 = vpop.f32.mrf.mxu1 }
  0xe0   : > { %v4076_v50 = vpop.f32.mrf.mxu0 }
  0xe3   : > { %v863_v51 = vpop.f32.mrf.mxu1  ;;  %v486_v52 = vpop.f32.mrf.mxu0 }
  0xe4   : > { %v665_v10 = vadd.f32 %v664_v39, %v486_v52 }
  0xe5   : > { %v3376_v53 = vpop.f32.mrf.mxu1  ;;  %v3342_v54 = vpop.f32.mrf.mxu0 }
  0xe6   : > { %v879_v17 = vadd.f32 %v863_v51, %v665_v10 }
  0xe7   : > { %v868_v55 = vpop.f32.mrf.mxu1  ;;  %v491_v56 = vpop.f32.mrf.mxu0 }
  0xe8   : > { %v670_v16 = vadd.f32 %v669_v43, %v491_v56 }
  0xe9   : > { %v3379_v57 = vpop.f32.mrf.mxu1  ;;  %v3345_v58 = vpop.f32.mrf.mxu0 }
  0xea   : > { %v882_v24 = vadd.f32 %v868_v55, %v670_v16 }
  0xeb   : > { %v873_v59 = vpop.f32.mrf.mxu1 }
  0xec   : > { %v496_v60 = vpop.f32.mrf.mxu0 }
  0xed   : > { %v3382_v61 = vpop.f32.mrf.mxu1  ;;  %v675_v23 = vadd.f32 %v674_v47, %v496_v60  ;;  %v1309_v60 = vsub.s32 1, %v4078_v7 }
  0xee   : > { %v3348_v62 = vpop.f32.mrf.mxu0 }
  0xef   : > { %v885_v32 = vadd.f32 %v873_v59, %v675_v23  ;;  %v1305_v59 = vsub.s32 0, %v4078_v7 }
  0xf1   : > { %v1071_v63 = vpop.f32.mrf.mxu1  ;;  %v581_v0 = vpop.f32.mrf.mxu0  ;;  %v1306_v10 = vrot.slane %v1301_v15, %v1305_v59 }
  0xf2   : > { %v1087_v19 = vadd.f32 %v1071_v63, %v879_v17  ;;  %v582_v57 = vadd.f32 %v581_v0, %v4066_v40  ;;  %v1310_v40 = vrot.slane %v1301_v15, %v1309_v60 }
  0xf3   : > { %v3393_v3 = vpop.f32.mrf.mxu1  ;;  %v583_v4 = vpop.f32.mrf.mxu0 }
  0xf4   : > { %v584_v61 = vadd.f32 %v583_v4, %v4068_v42 }
  0xf5   : > { %v1076_v5 = vpop.f32.mrf.mxu1  ;;  %v587_v6 = vpop.f32.mrf.mxu0 }
  0xf6   : > { %v1090_v28 = vadd.f32 %v1076_v5, %v882_v24  ;;  %v588_v1 = vadd.f32 %v587_v6, %v4070_v44 }
  0xf7   : > { %v3396_v8 = vpop.f32.mrf.mxu1  ;;  %v589_v9 = vpop.f32.mrf.mxu0 }
  0xf8   : > { %v590_v0 = vadd.f32 %v589_v9, %v4072_v46 }
  0xf9   : > { %v1081_v11 = vpop.f32.mrf.mxu1 }
  0xfa   : > { %v4080_v12 = vpop.f32.mrf.mxu0  ;;  %v1093_v37 = vadd.f32 %v1081_v11, %v885_v32 }
  0xfb   : > { %v3399_v14 = vpop.f32.mrf.mxu1  ;;  %v594_v42 = vadd.f32 %v4080_v12, %v4074_v48 }
  0xfc   : > { %v595_v18 = vpop.f32.mrf.mxu0 }
  0xff   : > { %v1278_v21 = vpop.f32.mrf.mxu1  ;;  %v780_v22 = vpop.f32.mrf.mxu0 }
 0x100   : > { %v1294_v25 = vadd.f32 %v1278_v21, %v1087_v19  ;;  %v877_v62 = vadd.f32 %v780_v22, %v582_v57  ;;  %v596_v19 = vadd.f32 %v595_v18, %v4076_v50  ;;  %v1706_v57 = vld [vmem:[%s5299_s5 + $0x120] sm:$0xff] }
 0x101   : > { %v3410_v26 = vpop.f32.mrf.mxu1  ;;  %v782_v27 = vpop.f32.mrf.mxu0 }
 0x102   : > { %v1320_v29 = vadd.f32 %v1314_v20, %v1294_v25  ;;  %v878_v3 = vadd.f32 %v782_v27, %v584_v61  ;;  %v1702_v61 = vld [vmem:[%s5299_s5 + $0x100] sm:$0xff] }
 0x103   : > { %v1283_v30 = vpop.f32.mrf.mxu1  ;;  %v786_v31 = vpop.f32.mrf.mxu0 }
 0x104   : > { %v1329_v33 = vmax.f32 %v1320_v29, 0.0  ;;  %v1297_v34 = vadd.f32 %v1283_v30, %v1090_v28  ;;  %v880_v11 = vadd.f32 %v786_v31, %v588_v1  ;;  %v1695_v1 = vld [vmem:[%s5299_s5 + $0xc8] sm:$0xff] }
 0x105   : > { %v3413_v35 = vpop.f32.mrf.mxu1  ;;  %v788_v36 = vpop.f32.mrf.mxu0 }
 0x106   : > { %v1323_v38 = vadd.f32 %v1314_v20, %v1297_v34  ;;  %2990 = vmatmul.mubr.msk.f32.vlgmr.msra.gmra.mxu1 %vm1408_vm6, %v1329_v33  ;;  %v881_v4 = vadd.f32 %v788_v36, %v590_v0  ;;  %v1683_v0 = vld [vmem:[%s5299_s5 + $0x68] sm:$0xff] }
 0x107   : > { %v1288_v39 = vpop.f32.mrf.mxu1  ;;  %v792_v41 = vpop.f32.mrf.mxu0  ;;  %1571 = vmatprep.mubr.f32.mxu1 %v3435_v2 }
 0x108   : > { %v1332_v43 = vmax.f32 %v1323_v38, 0.0  ;;  %v1300_v45 = vadd.f32 %v1288_v39, %v1093_v37  ;;  %v883_v22 = vadd.f32 %v792_v41, %v594_v42  ;;  %v1731_v38 = vld [vmem:[%s5299_s5 + $0x1e8] sm:$0xff]  ;;  %v1730_v39 = vld [vmem:[%s5299_s5 + $0x1e0] sm:$0xff] }
 0x109   : > { %v794_v47 = vpop.f32.mrf.mxu0  ;;  %v3416_v49 = vpop.f32.mrf.mxu1  ;;  %v1727_v41 = vld [vmem:[%s5299_s5 + $0x1c8] sm:$0xff]  ;;  %1973 = vmatprep.subr.mxu0 %v1731_v38  ;;  %v1674_v42 = vld [vmem:[%s5299_s5 + $0x20] sm:$0xff] }
 0x10a   : > { %v1326_v51 = vadd.f32 %v1314_v20, %v1300_v45  ;;  %2991 = vmatmul.mubr.msk.f32.gmra.mxu1 %vm1408_vm6, %v1332_v43  ;;  %v884_v46 = vadd.f32 %v794_v47, %v596_v19  ;;  %v1726_v43 = vld [vmem:[%s5299_s5 + $0x1c0] sm:$0xff]  ;;  %v1723_v45 = vld [vmem:[%s5299_s5 + $0x1a8] sm:$0xff] }
 0x10b   : > { %v988_v52 = vpop.f32.mrf.mxu0  ;;  %1577 = vmatprep.mubr.f32.mxu1 %v3435_v2  ;;  %v1722_v47 = vld [vmem:[%s5299_s5 + $0x1a0] sm:$0xff]  ;;  %v1719_v49 = vld [vmem:[%s5299_s5 + $0x188] sm:$0xff] }
 0x10c   : > { %v1335_v53 = vmax.f32 %v1326_v51, 0.0  ;;  %v1085_v5 = vadd.f32 %v988_v52, %v877_v62  ;;  %v1718_v51 = vld [vmem:[%s5299_s5 + $0x180] sm:$0xff]  ;;  %v1715_v52 = vld [vmem:[%s5299_s5 + $0x168] sm:$0xff] }
 0x10d   : > { %v990_v54 = vpop.f32.mrf.mxu0  ;;  %v1699_v62 = vld [vmem:[%s5299_s5 + $0xe8] sm:$0xff] }
 0x10e   : > { %2992 = vmatmul.mubr.msk.f32.gmra.mxu1 %vm1408_vm6, %v1335_v53  ;;  %v1086_v14 = vadd.f32 %v990_v54, %v878_v3  ;;  %v1714_v53 = vld [vmem:[%s5299_s5 + $0x160] sm:$0xff]  ;;  %v1711_v54 = vld [vmem:[%s5299_s5 + $0x148] sm:$0xff] }
 0x10f   : > { %v994_v55 = vpop.f32.mrf.mxu0  ;;  %1657 = vmatprep.mubr.f32.mxu1 %v3435_v2  ;;  %v1694_v3 = vld [vmem:[%s5299_s5 + $0xc0] sm:$0xff]  ;;  %v3044_v38 = vld [vmem:[%s5299_s5 + $0x3c8] sm:$0xff] }
 0x110   : > { %v1088_v44 = vadd.f32 %v994_v55, %v880_v11  ;;  %v1710_v55 = vld [vmem:[%s5299_s5 + $0x140] sm:$0xff] }
 0x111   : > { %v996_v56 = vpop.f32.mrf.mxu0  ;;  %v1682_v11 = vld [vmem:[%s5299_s5 + $0x60] sm:$0xff] }
 0x112   : > { %v1089_v23 = vadd.f32 %v996_v56, %v881_v4  ;;  %v1707_v56 = vld [vmem:[%s5299_s5 + $0x128] sm:$0xff] }
 0x113   : > { %v1000_v58 = vpop.f32.mrf.mxu0  ;;  %v1671_v4 = vld [vmem:[%s5299_s5 + $0x8] sm:$0xff] }
 0x114   : > { %v1091_v9 = vadd.f32 %v1000_v58, %v883_v22  ;;  %v1703_v58 = vld [vmem:[%s5299_s5 + $0x108] sm:$0xff] }
 0x115   : > { %v1002_v63 = vpop.f32.mrf.mxu0 }
 0x116   : > { %v1092_v48 = vadd.f32 %v1002_v63, %v884_v46  ;;  %v1698_v63 = vld [vmem:[%s5299_s5 + $0xe0] sm:$0xff] }
 0x117   : > { %v1195_v8 = vpop.f32.mrf.mxu0 }
 0x118   : > { %v1292_v16 = vadd.f32 %v1195_v8, %v1085_v5  ;;  %v1691_v5 = vld [vmem:[%s5299_s5 + $0xa8] sm:$0xff]  ;;  %v1690_v8 = vld [vmem:[%s5299_s5 + $0xa0] sm:$0xff] }
 0x119   : > { %v1197_v17 = vpop.f32.mrf.mxu0 }
 0x11a   : > { %v1293_v6 = vadd.f32 %v1197_v17, %v1086_v14  ;;  %v1318_v20 = vadd.f32 %v1306_v10, %v1292_v16  ;;  %v1679_v14 = vld [vmem:[%s5299_s5 + $0x48] sm:$0xff]  ;;  %v1678_v16 = vld [vmem:[%s5299_s5 + $0x40] sm:$0xff] }
 0x11b   : > { %v1201_v21 = vpop.f32.mrf.mxu0  ;;  %v1675_v17 = vld [vmem:[%s5299_s5 + $0x28] sm:$0xff] }
 0x11c   : > { %v1319_v24 = vadd.f32 %v1310_v40, %v1293_v6  ;;  %v1295_v15 = vadd.f32 %v1201_v21, %v1088_v44  ;;  %v1327_v28 = vmax.f32 %v1318_v20, 0.0  ;;  %v1670_v44 = vld [vmem:[%s5299_s5] sm:$0xff]  ;;  %v1739_v6 = vld [vmem:[%s5299_s5 + $0x228] sm:$0xff] }
 0x11d   : > { %v1203_v25 = vpop.f32.mrf.mxu0 }
 0x11e   : > { %v1328_v26 = vmax.f32 %v1319_v24, 0.0  ;;  %v1296_v27 = vadd.f32 %v1203_v25, %v1089_v23  ;;  %v1321_v29 = vadd.f32 %v1306_v10, %v1295_v15 }
 0x11f   : > { %v1207_v30 = vpop.f32.mrf.mxu0 }
 0x120   : > { %v1322_v12 = vadd.f32 %v1310_v40, %v1296_v27  ;;  %v1298_v31 = vadd.f32 %v1207_v30, %v1091_v9  ;;  %1482 = vmatprep.mubr.f32.mxu0 %v1328_v26  ;;  %v1330_v33 = vmax.f32 %v1321_v29, 0.0 }
 0x121   : > { %v1209_v32 = vpop.f32.mrf.mxu0  ;;  %1483 = vmatmul.mubr.f32.vlgmr.msra.gmra.mxu0 %v1327_v28 }
 0x122   : > { %v1331_v50 = vmax.f32 %v1322_v12, 0.0  ;;  %v1299_v18 = vadd.f32 %v1209_v32, %v1092_v48  ;;  %v1324_v34 = vadd.f32 %v1306_v10, %v1298_v31  ;;  %1974 = vmatpush1.msra.mxu0 %v1730_v39  ;;  %v1687_v10 = vld [vmem:[%s5299_s5 + $0x88] sm:$0xff]  ;;  %v1584_v32 = vld [vmem:[%s5298_s4] sm:$0xff] }
 0x123   : > { %1975 = vmatprep.subr.mxu0 %v1727_v41  ;;  %v3040_v39 = vld [vmem:[%s5299_s5 + $0x3a8] sm:$0xff]  ;;  %v3039_v41 = vld [vmem:[%s5299_s5 + $0x3a0] sm:$0xff] }
 0x124   : > { %v1325_v35 = vadd.f32 %v1310_v40, %v1299_v18  ;;  %1488 = vmatprep.mubr.f32.mxu0 %v1331_v50  ;;  %v1333_v37 = vmax.f32 %v1324_v34, 0.0  ;;  %1976 = vmatpush1.msra.mxu0 %v1726_v43  ;;  %v1686_v40 = vld [vmem:[%s5299_s5 + $0x80] sm:$0xff]  ;;  %v3056_v50 = vld [vmem:[%s5299_s5 + $0x428] sm:$0xff] }
 0x125   : > { %1489 = vmatmul.mubr.f32.gmra.mxu0 %v1330_v33  ;;  %1977 = vmatprep.subr.mxu0 %v1723_v45  ;;  %v3055_v18 = vld [vmem:[%s5299_s5 + $0x420] sm:$0xff]  ;;  %v3052_v33 = vld [vmem:[%s5299_s5 + $0x408] sm:$0xff] }
 0x126   : > { %v1334_v36 = vmax.f32 %v1325_v35, 0.0  ;;  %1978 = vmatpush1.msra.mxu0 %v1722_v47  ;;  %v3051_v34 = vld [vmem:[%s5299_s5 + $0x400] sm:$0xff]  ;;  %v1585_v35 = vld [vmem:[%s5298_s4 + $0x8] sm:$0xf] }
 0x127   : > { %1979 = vmatprep.subr.mxu0 %v1719_v49  ;;  %v3036_v43 = vld [vmem:[%s5299_s5 + $0x388] sm:$0xff]  ;;  %v3035_v45 = vld [vmem:[%s5299_s5 + $0x380] sm:$0xff] }
 0x128   : > { %1494 = vmatprep.mubr.f32.mxu0 %v1334_v36  ;;  %1980 = vmatpush1.msra.mxu0 %v1718_v51  ;;  %v3048_v36 = vld [vmem:[%s5299_s5 + $0x3e8] sm:$0xff]  ;;  %v3031_v49 = vld [vmem:[%s5299_s5 + $0x360] sm:$0xff] }
 0x129   : > { %1495 = vmatmul.mubr.f32.gmra.mxu0 %v1333_v37  ;;  %1981 = vmatprep.subr.mxu0 %v1715_v52  ;;  %v3047_v37 = vld [vmem:[%s5299_s5 + $0x3e0] sm:$0xff]  ;;  %v3032_v47 = vld [vmem:[%s5299_s5 + $0x368] sm:$0xff] }
 0x12a   : > { %1982 = vmatpush1.msra.mxu0 %v1714_v53  ;;  %v3028_v51 = vld [vmem:[%s5299_s5 + $0x348] sm:$0xff]  ;;  %v3027_v52 = vld [vmem:[%s5299_s5 + $0x340] sm:$0xff] }
 0x12b   : > { %1983 = vmatprep.subr.mxu0 %v1711_v54  ;;  %v3024_v53 = vld [vmem:[%s5299_s5 + $0x328] sm:$0xff]  ;;  %v3023_v54 = vld [vmem:[%s5299_s5 + $0x320] sm:$0xff] }
 0x12c   : > { %1984 = vmatpush1.msra.mxu0 %v1710_v55  ;;  %v3020_v55 = vld [vmem:[%s5299_s5 + $0x308] sm:$0xff] }
 0x12d   : > { %1985 = vmatprep.subr.mxu0 %v1707_v56  ;;  %v3019_v56 = vld [vmem:[%s5299_s5 + $0x300] sm:$0xff] }
 0x12e   : > { %1986 = vmatpush1.msra.mxu0 %v1706_v57  ;;  %v3016_v57 = vld [vmem:[%s5299_s5 + $0x2e8] sm:$0xff] }
 0x12f   : > { %1987 = vmatprep.subr.mxu0 %v1703_v58  ;;  %v3015_v58 = vld [vmem:[%s5299_s5 + $0x2e0] sm:$0xff] }
 0x130   : > { %1988 = vmatpush1.msra.mxu0 %v1702_v61  ;;  %v3012_v61 = vld [vmem:[%s5299_s5 + $0x2c8] sm:$0xff] }
 0x131   : > { %1989 = vmatprep.subr.mxu0 %v1699_v62  ;;  %v3011_v62 = vld [vmem:[%s5299_s5 + $0x2c0] sm:$0xff] }
 0x132   : > { %1990 = vmatpush1.msra.mxu0 %v1698_v63  ;;  %v3008_v63 = vld [vmem:[%s5299_s5 + $0x2a8] sm:$0xff] }
 0x133   : > { %1991 = vmatprep.subr.mxu0 %v1695_v1  ;;  %v3007_v1 = vld [vmem:[%s5299_s5 + $0x2a0] sm:$0xff] }
 0x134   : > { %1992 = vmatpush1.msra.mxu0 %v1694_v3  ;;  %v3004_v3 = vld [vmem:[%s5299_s5 + $0x288] sm:$0xff] }
 0x135   : > { %1993 = vmatprep.subr.mxu0 %v1691_v5  ;;  %v1738_v5 = vld [vmem:[%s5299_s5 + $0x220] sm:$0xff] }
 0x136   : > { %1994 = vmatpush1.msra.mxu0 %v1690_v8  ;;  %v3003_v8 = vld [vmem:[%s5299_s5 + $0x280] sm:$0xff] }
 0x137   : > { %1995 = vmatprep.subr.mxu0 %v1687_v10  ;;  %v1735_v10 = vld [vmem:[%s5299_s5 + $0x208] sm:$0xff] }
 0x138   : > { %1996 = vmatpush1.msra.mxu0 %v1686_v40  ;;  %v3000_v40 = vld [vmem:[%s5299_s5 + $0x268] sm:$0xff] }
 0x139   : > { %1997 = vmatprep.subr.mxu0 %v1683_v0  ;;  %v1734_v0 = vld [vmem:[%s5299_s5 + $0x200] sm:$0xff] }
 0x13a   : > { %1998 = vmatpush1.msra.mxu0 %v1682_v11  ;;  %v2999_v11 = vld [vmem:[%s5299_s5 + $0x260] sm:$0xff] }
 0x13b   : > { %1999 = vmatprep.subr.mxu0 %v1679_v14  ;;  %v3132_v14 = vld [vmem:[%s5299_s5 + $0x668] sm:$0xff] }
 0x13c   : > { %2000 = vmatpush1.msra.mxu0 %v1678_v16  ;;  %v2996_v16 = vld [vmem:[%s5299_s5 + $0x248] sm:$0xff] }
 0x13d   : > { %2001 = vmatprep.subr.mxu0 %v1675_v17  ;;  %v2995_v17 = vld [vmem:[%s5299_s5 + $0x240] sm:$0xff] }
 0x13e   : > { %2002 = vmatpush1.msra.mxu0 %v1674_v42  ;;  %v3064_v42 = vld [vmem:[%s5299_s5 + $0x468] sm:$0xff] }
 0x13f   : > { %2003 = vmatprep.subr.mxu0 %v1671_v4  ;;  %v3063_v4 = vld [vmem:[%s5299_s5 + $0x460] sm:$0xff] }
 0x140   : > { %2004 = vmatpush1.msra.mxu0 %v1670_v44  ;;  %v3060_v44 = vld [vmem:[%s5299_s5 + $0x448] sm:$0xff] }
 0x141   : > { %2033 = vmatprep.subr.mxu0 %v1739_v6  ;;  %v3059_v6 = vld [vmem:[%s5299_s5 + $0x440] sm:$0xff] }
 0x142   : > { %2034 = vmatpush2.msra.mxu0 %v1738_v5  ;;  %v3030_v5 = vld [vmem:[%s5299_s5 + $0x358] sm:$0xff] }
 0x143   : > { %2035 = vmatprep.subr.mxu0 %v1735_v10  ;;  %v3029_v10 = vld [vmem:[%s5299_s5 + $0x350] sm:$0xff] }
 0x144   : > { %2036 = vmatpush2.msra.mxu0 %v1734_v0  ;;  %v3026_v0 = vld [vmem:[%s5299_s5 + $0x338] sm:$0xff] }
 0x145   : > { %2197 = vmatprep.subr.mxu0 %v3132_v14  ;;  %v3025_v14 = vld [vmem:[%s5299_s5 + $0x330] sm:$0xff] }
 0x1c6   : > { %v1567_v19 = vpop.f32.mrf.mxu1 }
 0x1c8   : > { %v1569_v20 = vpop.f32.mrf.mxu1 }
 0x1ca   : > { %v1573_v21 = vpop.f32.mrf.mxu1 }
 0x1cc   : > { %v1575_v23 = vpop.f32.mrf.mxu1 }
 0x1ce   : > { %v1579_v25 = vpop.f32.mrf.mxu1 }
 0x1d0   : > { %v1581_v26 = vpop.f32.mrf.mxu1 }
 0x1e1   : > { %v1484_v22 = vpop.f32.mrf.mxu0 }
 0x1e2   : > { %v1568_v31 = vadd.f32 %v1567_v19, %v1484_v22  ;;  %v3058_v19 = vld [vmem:[%s5299_s5 + $0x438] sm:$0xff]  ;;  %v3131_v22 = vld [vmem:[%s5299_s5 + $0x660] sm:$0xff] }
 0x1e3   : > { %v1486_v24 = vpop.f32.mrf.mxu0 }
 0x1e4   : > { %v1570_v12 = vadd.f32 %v1569_v20, %v1486_v24 }
 0x1e5   : > { %v1490_v15 = vpop.f32.mrf.mxu0 }
 0x1e6   : > { %v1574_v48 = vadd.f32 %v1573_v21, %v1490_v15  ;;  %v3127_v15 = vld [vmem:[%s5299_s5 + $0x640] sm:$0xff] }
 0x1e7   : > { %v1492_v46 = vpop.f32.mrf.mxu0 }
 0x1e8   : > { %v1576_v30 = vadd.f32 %v1575_v23, %v1492_v46  ;;  %v3128_v23 = vld [vmem:[%s5299_s5 + $0x648] sm:$0xff] }
 0x1e9   : > { %v1496_v9 = vpop.f32.mrf.mxu0 }
 0x1ea   : > { %v1580_v29 = vadd.f32 %v1579_v25, %v1496_v9  ;;  %v3124_v25 = vld [vmem:[%s5299_s5 + $0x628] sm:$0xff] }
 0x1eb   : > { %v1498_v27 = vpop.f32.mrf.mxu0 }
 0x1ec   : > { %v1582_v28 = vadd.f32 %v1581_v26, %v1498_v27  ;;  %v3123_v26 = vld [vmem:[%s5299_s5 + $0x620] sm:$0xff] }
 0x1ee   : > { %1619 = vmatprep.subr.mxu1 %v1582_v28 }
 0x1ef   : > { %1620 = vmatpush1.msra.mxu1 %v1580_v29  ;;  %v3120_v29 = vld [vmem:[%s5299_s5 + $0x608] sm:$0xff] }
 0x1f0   : > { %1621 = vmatprep.subr.mxu1 %v1576_v30 }
 0x1f1   : > { %1622 = vmatpush1.msra.mxu1 %v1574_v48  ;;  %v3119_v48 = vld [vmem:[%s5299_s5 + $0x600] sm:$0xff] }
 0x1f2   : > { %1623 = vmatprep.subr.mxu1 %v1570_v12 }
 0x1f3   : > { %1624 = vmatpush1.msra.mxu1 %v1568_v31 }
 0x1f4   : > { %2993 = vmatmul.mubr.msk.f32.vlgmr.msra.gmra.mxu1 %vm1586_vm7, %v1584_v32  ;;  %1829 = vmatprep.subr.mxu1 %v3056_v50  ;;  %v3057_v50 = vld [vmem:[%s5299_s5 + $0x430] sm:$0xff] }
 0x1f5   : > { %1663 = vmatprep.mubr.f32.mxu1 %v3435_v2  ;;  %1830 = vmatpush1.msra.mxu1 %v3055_v18  ;;  %v3043_v2 = vld [vmem:[%s5299_s5 + $0x3c0] sm:$0xff]  ;;  %v3116_v18 = vld [vmem:[%s5299_s5 + $0x5e8] sm:$0xff] }
 0x1f6   : > { %1831 = vmatprep.subr.mxu1 %v3052_v33 }
 0x1f7   : > { %1832 = vmatpush1.msra.mxu1 %v3051_v34 }
 0x1f8   : > { %2994 = vmatmul.mubr.msk.f32.gmra.mxu1 %vm1586_vm7, %v1585_v35  ;;  %1833 = vmatprep.subr.mxu1 %v3048_v36  ;;  %v3054_v35 = vld [vmem:[%s5299_s5 + $0x418] sm:$0xff]  ;;  %v3115_v36 = vld [vmem:[%s5299_s5 + $0x5e0] sm:$0xff] }
 0x1f9   : > { %1834 = vmatpush1.msra.mxu1 %v3047_v37  ;;  %v3053_v37 = vld [vmem:[%s5299_s5 + $0x410] sm:$0xff] }
 0x1fa   : > { %1835 = vmatprep.subr.mxu1 %v3044_v38  ;;  %v3112_v38 = vld [vmem:[%s5299_s5 + $0x5c8] sm:$0xff] }
 0x1fb   : > { %1836 = vmatpush1.msra.mxu1 %v3043_v2  ;;  %v3050_v2 = vld [vmem:[%s5299_s5 + $0x3f8] sm:$0xff] }
 0x1fc   : > { %1837 = vmatprep.subr.mxu1 %v3040_v39  ;;  %v3111_v39 = vld [vmem:[%s5299_s5 + $0x5c0] sm:$0xff] }
 0x1fd   : > { %1838 = vmatpush1.msra.mxu1 %v3039_v41  ;;  %v3049_v41 = vld [vmem:[%s5299_s5 + $0x3f0] sm:$0xff] }
 0x1fe   : > { %1839 = vmatprep.subr.mxu1 %v3036_v43  ;;  %v3108_v43 = vld [vmem:[%s5299_s5 + $0x5a8] sm:$0xff] }
 0x1ff   : > { %1840 = vmatpush1.msra.mxu1 %v3035_v45  ;;  %v3046_v45 = vld [vmem:[%s5299_s5 + $0x3d8] sm:$0xff] }
 0x200   : > { %1841 = vmatprep.subr.mxu1 %v3032_v47  ;;  %v3107_v47 = vld [vmem:[%s5299_s5 + $0x5a0] sm:$0xff] }
 0x201   : > { %1842 = vmatpush1.msra.mxu1 %v3031_v49  ;;  %v3045_v49 = vld [vmem:[%s5299_s5 + $0x3d0] sm:$0xff] }
 0x202   : > { %1843 = vmatprep.subr.mxu1 %v3028_v51  ;;  %v3104_v51 = vld [vmem:[%s5299_s5 + $0x588] sm:$0xff] }
 0x203   : > { %1844 = vmatpush1.msra.mxu1 %v3027_v52  ;;  %v3042_v52 = vld [vmem:[%s5299_s5 + $0x3b8] sm:$0xff] }
 0x204   : > { %1845 = vmatprep.subr.mxu1 %v3024_v53  ;;  %v3103_v53 = vld [vmem:[%s5299_s5 + $0x580] sm:$0xff] }
 0x205   : > { %1846 = vmatpush1.msra.mxu1 %v3023_v54  ;;  %v3041_v54 = vld [vmem:[%s5299_s5 + $0x3b0] sm:$0xff] }
 0x206   : > { %1847 = vmatprep.subr.mxu1 %v3020_v55  ;;  %v3100_v55 = vld [vmem:[%s5299_s5 + $0x568] sm:$0xff] }
 0x207   : > { %1848 = vmatpush1.msra.mxu1 %v3019_v56  ;;  %v3038_v56 = vld [vmem:[%s5299_s5 + $0x398] sm:$0xff] }
 0x208   : > { %1849 = vmatprep.subr.mxu1 %v3016_v57  ;;  %v3099_v57 = vld [vmem:[%s5299_s5 + $0x560] sm:$0xff] }
 0x209   : > { %1850 = vmatpush1.msra.mxu1 %v3015_v58  ;;  %v3037_v58 = vld [vmem:[%s5299_s5 + $0x390] sm:$0xff] }
 0x20a   : > { %1851 = vmatprep.subr.mxu1 %v3012_v61  ;;  %v3096_v61 = vld [vmem:[%s5299_s5 + $0x548] sm:$0xff] }
 0x20b   : > { %1852 = vmatpush1.msra.mxu1 %v3011_v62  ;;  %v3034_v62 = vld [vmem:[%s5299_s5 + $0x378] sm:$0xff] }
 0x20c   : > { %1853 = vmatprep.subr.mxu1 %v3008_v63  ;;  %v3095_v63 = vld [vmem:[%s5299_s5 + $0x540] sm:$0xff] }
 0x20d   : > { %1854 = vmatpush1.msra.mxu1 %v3007_v1  ;;  %v3033_v1 = vld [vmem:[%s5299_s5 + $0x370] sm:$0xff] }
 0x20e   : > { %1855 = vmatprep.subr.mxu1 %v3004_v3  ;;  %v3092_v3 = vld [vmem:[%s5299_s5 + $0x528] sm:$0xff] }
 0x20f   : > { %1856 = vmatpush1.msra.mxu1 %v3003_v8  ;;  %v3091_v8 = vld [vmem:[%s5299_s5 + $0x520] sm:$0xff] }
 0x210   : > { %1857 = vmatprep.subr.mxu1 %v3000_v40  ;;  %v3088_v40 = vld [vmem:[%s5299_s5 + $0x508] sm:$0xff] }
 0x211   : > { %1858 = vmatpush1.msra.mxu1 %v2999_v11  ;;  %v3087_v11 = vld [vmem:[%s5299_s5 + $0x500] sm:$0xff] }
 0x212   : > { %1859 = vmatprep.subr.mxu1 %v2996_v16  ;;  %v3084_v16 = vld [vmem:[%s5299_s5 + $0x4e8] sm:$0xff] }
 0x213   : > { %1860 = vmatpush1.msra.mxu1 %v2995_v17  ;;  %v3022_v17 = vld [vmem:[%s5299_s5 + $0x318] sm:$0xff] }
 0x214   : > { %1889 = vmatprep.subr.mxu1 %v3064_v42  ;;  %v3083_v42 = vld [vmem:[%s5299_s5 + $0x4e0] sm:$0xff] }
 0x215   : > { %1890 = vmatpush2.msra.mxu1 %v3063_v4  ;;  %v3021_v4 = vld [vmem:[%s5299_s5 + $0x310] sm:$0xff] }
 0x216   : > { %1891 = vmatprep.subr.mxu1 %v3060_v44  ;;  %v3080_v44 = vld [vmem:[%s5299_s5 + $0x4c8] sm:$0xff] }
 0x217   : > { %1892 = vmatpush2.msra.mxu1 %v3059_v6  ;;  %v3018_v6 = vld [vmem:[%s5299_s5 + $0x2f8] sm:$0xff] }
 0x218   : > { %1900 = vmatprep.subr.mxu1 %v3058_v19  ;;  %v3079_v19 = vld [vmem:[%s5299_s5 + $0x4c0] sm:$0xff] }
 0x2b4   : > { %v4338_v20 = vpop.f32.mrf.mxu1 }
 0x2b5   : > { %v1819_v12 = vrot.slane %v4338_v20, 1 }
 0x2b6   : > { %v4340_v21 = vpop.f32.mrf.mxu1 }
 0x2b7   : > { %3069 = vmatprep.mubr.msk.f32.mxu0 %vm1826_vm8, %v4340_v21  ;;  %v1822_v30 = vrot.slane %v4340_v21, 1  ;;  %v2191_v31 = vrot.slane %v4340_v21, 2 }
 0x2b8   : > { %v4350_v24 = vpop.f32.mrf.mxu1  ;;  %2038 = vmatmul.mubr.f32.vlgmr.msra.gmra.mxu0 %v4338_v20 }
 0x2b9   : > { %2198 = vmatpush1.msra.mxu0 %v3131_v22  ;;  %v1820_v46 = vrot.slane %v4350_v24, 1  ;;  %v3017_v22 = vld [vmem:[%s5299_s5 + $0x2f0] sm:$0xff] }
 0x2ba   : > { %2199 = vmatprep.subr.mxu0 %v3128_v23  ;;  %v4360_v9 = vpop.f32.mrf.mxu1  ;;  %v3076_v23 = vld [vmem:[%s5299_s5 + $0x4a8] sm:$0xff] }
 0x2bb   : > { %v1823_v27 = vrot.slane %v4360_v9, 1  ;;  %v2192_v28 = vrot.slane %v4360_v9, 2  ;;  %2200 = vmatpush1.msra.mxu0 %v3127_v15  ;;  %v4385_v33 = vsel %vm312_vm2, %v1819_v12, %v1820_v46  ;;  %v3014_v15 = vld [vmem:[%s5299_s5 + $0x2d8] sm:$0xff]  ;;  %v3013_v46 = vld [vmem:[%s5299_s5 + $0x2d0] sm:$0xff]  ;;  %v3139_v12 = vld [vmem:[%s5299_s5 + $0x6a0] sm:$0xff] }
 0x2bc   : > { %2201 = vmatprep.subr.mxu0 %v3124_v25  ;;  %v3075_v25 = vld [vmem:[%s5299_s5 + $0x4a0] sm:$0xff] }
 0x2bd   : > { %2202 = vmatpush1.msra.mxu0 %v3123_v26  ;;  %v1824_v32 = vsel %vm312_vm2, %v1822_v30, %v1823_v27  ;;  %v4388_v34 = vsel %vm691_vm4, %v2191_v31, %v2192_v28  ;;  %v3072_v26 = vld [vmem:[%s5299_s5 + $0x488] sm:$0xff]  ;;  %v3010_v27 = vld [vmem:[%s5299_s5 + $0x2b8] sm:$0xff]  ;;  %v3071_v28 = vld [vmem:[%s5299_s5 + $0x480] sm:$0xff]  ;;  %v2189_v31 = vrot.slane %v4350_v24, 2 }
 0x2be   : > { %2203 = vmatprep.subr.mxu0 %v3120_v29  ;;  %3067 = vmatprep.mubr.msk.f32.mxu1 %vm1826_vm8, %v1824_v32  ;;  %v3009_v29 = vld [vmem:[%s5299_s5 + $0x2b0] sm:$0xff]  ;;  %v3140_v30 = vld [vmem:[%s5299_s5 + $0x6a8] sm:$0xff] }
 0x2bf   : > { %2204 = vmatpush1.msra.mxu0 %v3119_v48  ;;  %1894 = vmatmul.mubr.f32.vlgmr.msra.gmra.mxu1 %v4385_v33  ;;  %v3006_v48 = vld [vmem:[%s5299_s5 + $0x298] sm:$0xff] }
 0x2c0   : > { %1901 = vmatpush1.msra.mxu1 %v3057_v50  ;;  %2205 = vmatprep.subr.mxu0 %v3116_v18  ;;  %v3136_v50 = vld [vmem:[%s5299_s5 + $0x688] sm:$0xff]  ;;  %v3002_v18 = vld [vmem:[%s5299_s5 + $0x278] sm:$0xff] }
 0x2c1   : > { %3143 = vmatprep.mubr.msk.f32.mxu0 %vm1826_vm8, %v4388_v34  ;;  %1902 = vmatprep.subr.mxu1 %v3054_v35  ;;  %v3135_v35 = vld [vmem:[%s5299_s5 + $0x680] sm:$0xff] }
 0x2c2   : > { %3068 = vmatprep.mubr.msk.f32.mxu1 %vm1826_vm8, %v1824_v32  ;;  %2206 = vmatpush1.msra.mxu0 %v3115_v36  ;;  %v3005_v32 = vld [vmem:[%s5299_s5 + $0x290] sm:$0xff]  ;;  %v2420_v36 = vrot.slane %v4360_v9, 3 }
 0x2c3   : > { %1903 = vmatpush1.msra.mxu1 %v3053_v37  ;;  %2207 = vmatprep.subr.mxu0 %v3112_v38  ;;  %v3001_v37 = vld [vmem:[%s5299_s5 + $0x270] sm:$0xff]  ;;  %v2188_v38 = vrot.slane %v4338_v20, 2 }
 0x2c4   : > { %1904 = vmatprep.subr.mxu1 %v3050_v2  ;;  %2208 = vmatpush1.msra.mxu0 %v3111_v39  ;;  %v3206_v2 = vld [vmem:[%s5299_s5 + $0x8a8] sm:$0xff]  ;;  %v2998_v39 = vld [vmem:[%s5299_s5 + $0x258] sm:$0xff] }
 0x2c5   : > { %1905 = vmatpush1.msra.mxu1 %v3049_v41  ;;  %2209 = vmatprep.subr.mxu0 %v3108_v43  ;;  %v4569_v41 = vsel %vm691_vm4, %v2188_v38, %v2189_v31  ;;  %v3205_v43 = vld [vmem:[%s5299_s5 + $0x8a0] sm:$0xff]  ;;  %v3162_v31 = vld [vmem:[%s5299_s5 + $0x748] sm:$0xff]  ;;  %v1696_v38 = vld [vmem:[%s5299_s5 + $0xd0] sm:$0xff] }
 0x2c6   : > { %1906 = vmatprep.subr.mxu1 %v3046_v45  ;;  %2210 = vmatpush1.msra.mxu0 %v3107_v47  ;;  %v2419_v45 = vrot.slane %v4340_v21, 3  ;;  %v2997_v47 = vld [vmem:[%s5299_s5 + $0x250] sm:$0xff] }
 0x2c7   : > { %1907 = vmatpush1.msra.mxu1 %v3045_v49  ;;  %2211 = vmatprep.subr.mxu0 %v3104_v51  ;;  %v3202_v49 = vld [vmem:[%s5299_s5 + $0x888] sm:$0xff] }
 0x2c8   : > { %1908 = vmatprep.subr.mxu1 %v3042_v52  ;;  %2212 = vmatpush1.msra.mxu0 %v3103_v53  ;;  %v4583_v51 = vsel %vm899_vm5, %v2419_v45, %v2420_v36  ;;  %v3066_v52 = vld [vmem:[%s5299_s5 + $0x478] sm:$0xff]  ;;  %v3201_v53 = vld [vmem:[%s5299_s5 + $0x880] sm:$0xff]  ;;  %v1692_v45 = vld [vmem:[%s5299_s5 + $0xb0] sm:$0xff] }
 0x2c9   : > { %1909 = vmatpush1.msra.mxu1 %v3041_v54  ;;  %2213 = vmatprep.subr.mxu0 %v3100_v55  ;;  %v3065_v54 = vld [vmem:[%s5299_s5 + $0x470] sm:$0xff]  ;;  %v3198_v55 = vld [vmem:[%s5299_s5 + $0x868] sm:$0xff]  ;;  %v1697_v36 = vld [vmem:[%s5299_s5 + $0xd8] sm:$0xff] }
 0x2ca   : > { %1910 = vmatprep.subr.mxu1 %v3038_v56  ;;  %2214 = vmatpush1.msra.mxu0 %v3099_v57  ;;  %v3062_v56 = vld [vmem:[%s5299_s5 + $0x458] sm:$0xff]  ;;  %v3197_v57 = vld [vmem:[%s5299_s5 + $0x860] sm:$0xff] }
 0x2cb   : > { %1911 = vmatpush1.msra.mxu1 %v3037_v58  ;;  %2215 = vmatprep.subr.mxu0 %v3096_v61  ;;  %v3061_v58 = vld [vmem:[%s5299_s5 + $0x450] sm:$0xff]  ;;  %v3194_v61 = vld [vmem:[%s5299_s5 + $0x848] sm:$0xff] }
 0x2cc   : > { %1912 = vmatprep.subr.mxu1 %v3034_v62  ;;  %2216 = vmatpush1.msra.mxu0 %v3095_v63  ;;  %v1733_v62 = vld [vmem:[%s5299_s5 + $0x1f8] sm:$0xff]  ;;  %v3193_v63 = vld [vmem:[%s5299_s5 + $0x840] sm:$0xff] }
 0x2cd   : > { %1913 = vmatpush1.msra.mxu1 %v3033_v1  ;;  %2217 = vmatprep.subr.mxu0 %v3092_v3  ;;  %v1732_v1 = vld [vmem:[%s5299_s5 + $0x1f0] sm:$0xff]  ;;  %v3190_v3 = vld [vmem:[%s5299_s5 + $0x828] sm:$0xff] }
 0x2ce   : > { %1914 = vmatprep.subr.mxu1 %v3030_v5  ;;  %2218 = vmatpush1.msra.mxu0 %v3091_v8  ;;  %v1729_v5 = vld [vmem:[%s5299_s5 + $0x1d8] sm:$0xff]  ;;  %v3189_v8 = vld [vmem:[%s5299_s5 + $0x820] sm:$0xff] }
 0x2cf   : > { %1915 = vmatpush1.msra.mxu1 %v3029_v10  ;;  %2219 = vmatprep.subr.mxu0 %v3088_v40  ;;  %v1728_v10 = vld [vmem:[%s5299_s5 + $0x1d0] sm:$0xff]  ;;  %v3186_v40 = vld [vmem:[%s5299_s5 + $0x808] sm:$0xff] }
 0x2d0   : > { %1916 = vmatprep.subr.mxu1 %v3026_v0  ;;  %2220 = vmatpush1.msra.mxu0 %v3087_v11  ;;  %v3185_v0 = vld [vmem:[%s5299_s5 + $0x800] sm:$0xff]  ;;  %v1724_v11 = vld [vmem:[%s5299_s5 + $0x1b0] sm:$0xff] }
 0x2d1   : > { %1917 = vmatpush1.msra.mxu1 %v3025_v14  ;;  %2221 = vmatprep.subr.mxu0 %v3084_v16  ;;  %v3182_v14 = vld [vmem:[%s5299_s5 + $0x7e8] sm:$0xff]  ;;  %v1721_v16 = vld [vmem:[%s5299_s5 + $0x198] sm:$0xff] }
 0x2d2   : > { %1918 = vmatprep.subr.mxu1 %v3022_v17  ;;  %2222 = vmatpush1.msra.mxu0 %v3083_v42  ;;  %v3181_v17 = vld [vmem:[%s5299_s5 + $0x7e0] sm:$0xff]  ;;  %v1720_v42 = vld [vmem:[%s5299_s5 + $0x190] sm:$0xff] }
 0x2d3   : > { %1919 = vmatpush1.msra.mxu1 %v3021_v4  ;;  %2223 = vmatprep.subr.mxu0 %v3080_v44  ;;  %v3178_v4 = vld [vmem:[%s5299_s5 + $0x7c8] sm:$0xff]  ;;  %v1717_v44 = vld [vmem:[%s5299_s5 + $0x178] sm:$0xff] }
 0x2d4   : > { %1920 = vmatprep.subr.mxu1 %v3018_v6  ;;  %2224 = vmatpush1.msra.mxu0 %v3079_v19  ;;  %v3177_v6 = vld [vmem:[%s5299_s5 + $0x7c0] sm:$0xff]  ;;  %v1716_v19 = vld [vmem:[%s5299_s5 + $0x170] sm:$0xff] }
 0x2d5   : > { %1921 = vmatpush1.msra.mxu1 %v3017_v22  ;;  %2225 = vmatprep.subr.mxu0 %v3076_v23  ;;  %v3174_v22 = vld [vmem:[%s5299_s5 + $0x7a8] sm:$0xff]  ;;  %v1713_v23 = vld [vmem:[%s5299_s5 + $0x158] sm:$0xff] }
 0x2d6   : > { %1922 = vmatprep.subr.mxu1 %v3014_v15  ;;  %2226 = vmatpush1.msra.mxu0 %v3075_v25  ;;  %v3173_v15 = vld [vmem:[%s5299_s5 + $0x7a0] sm:$0xff]  ;;  %v1712_v25 = vld [vmem:[%s5299_s5 + $0x150] sm:$0xff] }
 0x2d7   : > { %1923 = vmatpush1.msra.mxu1 %v3013_v46  ;;  %2227 = vmatprep.subr.mxu0 %v3072_v26  ;;  %v3170_v46 = vld [vmem:[%s5299_s5 + $0x788] sm:$0xff]  ;;  %v1709_v26 = vld [vmem:[%s5299_s5 + $0x138] sm:$0xff] }
 0x2d8   : > { %1924 = vmatprep.subr.mxu1 %v3010_v27  ;;  %2228 = vmatpush1.msra.mxu0 %v3071_v28  ;;  %v3169_v27 = vld [vmem:[%s5299_s5 + $0x780] sm:$0xff]  ;;  %v1708_v28 = vld [vmem:[%s5299_s5 + $0x130] sm:$0xff] }
 0x2d9   : > { %1925 = vmatpush1.msra.mxu1 %v3009_v29  ;;  %2257 = vmatprep.subr.mxu0 %v3140_v30  ;;  %v3166_v29 = vld [vmem:[%s5299_s5 + $0x768] sm:$0xff]  ;;  %v1705_v30 = vld [vmem:[%s5299_s5 + $0x118] sm:$0xff] }
 0x2da   : > { %1926 = vmatprep.subr.mxu1 %v3006_v48  ;;  %2258 = vmatpush2.msra.mxu0 %v3139_v12  ;;  %v3165_v48 = vld [vmem:[%s5299_s5 + $0x760] sm:$0xff]  ;;  %v1704_v12 = vld [vmem:[%s5299_s5 + $0x110] sm:$0xff] }
 0x2db   : > { %1927 = vmatpush1.msra.mxu1 %v3005_v32  ;;  %2259 = vmatprep.subr.mxu0 %v3136_v50  ;;  %v1701_v32 = vld [vmem:[%s5299_s5 + $0xf8] sm:$0xff]  ;;  %v3161_v50 = vld [vmem:[%s5299_s5 + $0x740] sm:$0xff] }
 0x2dc   : > { %1928 = vmatprep.subr.mxu1 %v3002_v18  ;;  %2260 = vmatpush2.msra.mxu0 %v3135_v35  ;;  %v1700_v18 = vld [vmem:[%s5299_s5 + $0xf0] sm:$0xff]  ;;  %v3158_v35 = vld [vmem:[%s5299_s5 + $0x728] sm:$0xff] }
 0x2dd   : > { %1929 = vmatpush1.msra.mxu1 %v3001_v37  ;;  %2262 = vmatmul.mubr.f32.vlgmr.msra.gmra.mxu0 %v4569_v41  ;;  %v3157_v37 = vld [vmem:[%s5299_s5 + $0x720] sm:$0xff] }
 0x2de   : > { %2425 = vmatprep.subr.mxu0 %v3206_v2  ;;  %1930 = vmatprep.subr.mxu1 %v2998_v39  ;;  %v3154_v2 = vld [vmem:[%s5299_s5 + $0x708] sm:$0xff]  ;;  %v1693_v39 = vld [vmem:[%s5299_s5 + $0xb8] sm:$0xff] }
 0x2df   : > { %2426 = vmatpush1.msra.mxu0 %v3205_v43  ;;  %3217 = vmatprep.mubr.msk.f32.mxu0 %vm1826_vm8, %v4583_v51  ;;  %v3153_v43 = vld [vmem:[%s5299_s5 + $0x700] sm:$0xff] }
 0x2e0   : > { %1931 = vmatpush1.msra.mxu1 %v2997_v47  ;;  %2427 = vmatprep.subr.mxu0 %v3202_v49  ;;  %v3150_v47 = vld [vmem:[%s5299_s5 + $0x6e8] sm:$0xff]  ;;  %v1689_v49 = vld [vmem:[%s5299_s5 + $0x98] sm:$0xff] }
 0x2e1   : > { %1960 = vmatprep.subr.mxu1 %v3066_v52  ;;  %2428 = vmatpush1.msra.mxu0 %v3201_v53  ;;  %v3149_v52 = vld [vmem:[%s5299_s5 + $0x6e0] sm:$0xff]  ;;  %v1688_v53 = vld [vmem:[%s5299_s5 + $0x90] sm:$0xff] }
 0x2e2   : > { %1961 = vmatpush2.msra.mxu1 %v3065_v54  ;;  %2429 = vmatprep.subr.mxu0 %v3198_v55  ;;  %v3146_v54 = vld [vmem:[%s5299_s5 + $0x6c8] sm:$0xff]  ;;  %v1685_v55 = vld [vmem:[%s5299_s5 + $0x78] sm:$0xff] }
 0x2e3   : > { %1962 = vmatprep.subr.mxu1 %v3062_v56  ;;  %2430 = vmatpush1.msra.mxu0 %v3197_v57  ;;  %v3145_v56 = vld [vmem:[%s5299_s5 + $0x6c0] sm:$0xff]  ;;  %v1684_v57 = vld [vmem:[%s5299_s5 + $0x70] sm:$0xff] }
 0x2e4   : > { %1963 = vmatpush2.msra.mxu1 %v3061_v58  ;;  %2431 = vmatprep.subr.mxu0 %v3194_v61  ;;  %v3214_v58 = vld [vmem:[%s5299_s5 + $0x8e8] sm:$0xff]  ;;  %v1681_v61 = vld [vmem:[%s5299_s5 + $0x58] sm:$0xff] }
 0x2e5   : > { %1965 = vmatmul.mubr.f32.vlgmr.msra.gmra.mxu1 %v4385_v33  ;;  %2044 = vmatprep.subr.mxu1 %v1733_v62  ;;  %v1725_v33 = vld [vmem:[%s5299_s5 + $0x1b8] sm:$0xff]  ;;  %v3213_v62 = vld [vmem:[%s5299_s5 + $0x8e0] sm:$0xff] }
 0x2e6   : > { %2432 = vmatpush1.msra.mxu0 %v3193_v63  ;;  %2045 = vmatpush1.msra.mxu1 %v1732_v1  ;;  %v2417_v63 = vrot.slane %v4350_v24, 3  ;;  %v1680_v1 = vld [vmem:[%s5299_s5 + $0x50] sm:$0xff] }
 0x2e7   : > { %3070 = vmatprep.mubr.msk.f32.mxu1 %vm1826_vm8, %v4340_v21  ;;  %2433 = vmatprep.subr.mxu0 %v3190_v3  ;;  %v3210_v3 = vld [vmem:[%s5299_s5 + $0x8c8] sm:$0xff] }
 0x2e8   : > { %2046 = vmatprep.subr.mxu1 %v1729_v5  ;;  %2434 = vmatpush1.msra.mxu0 %v3189_v8  ;;  %v1677_v5 = vld [vmem:[%s5299_s5 + $0x38] sm:$0xff]  ;;  %v3209_v8 = vld [vmem:[%s5299_s5 + $0x8c0] sm:$0xff] }
 0x2e9   : > { %2047 = vmatpush1.msra.mxu1 %v1728_v10  ;;  %2435 = vmatprep.subr.mxu0 %v3186_v40  ;;  %v2648_v10 = vrot.slane %v4360_v9, 4  ;;  %v1676_v40 = vld [vmem:[%s5299_s5 + $0x30] sm:$0xff] }
 0x2ea   : > { %2048 = vmatprep.subr.mxu1 %v1725_v33  ;;  %2436 = vmatpush1.msra.mxu0 %v3185_v0  ;;  %v2416_v33 = vrot.slane %v4338_v20, 3  ;;  %v3280_v0 = vld [vmem:[%s5299_s5 + $0xae8] sm:$0xff] }
 0x2eb   : > { %2049 = vmatpush1.msra.mxu1 %v1724_v11  ;;  %2437 = vmatprep.subr.mxu0 %v3182_v14  ;;  %v1673_v11 = vld [vmem:[%s5299_s5 + $0x18] sm:$0xff]  ;;  %v3279_v14 = vld [vmem:[%s5299_s5 + $0xae0] sm:$0xff] }
 0x2ec   : > { %2050 = vmatprep.subr.mxu1 %v1721_v16  ;;  %2438 = vmatpush1.msra.mxu0 %v3181_v17  ;;  %v4801_v9 = vsel %vm899_vm5, %v2416_v33, %v2417_v63  ;;  %v2647_v16 = vrot.slane %v4340_v21, 4  ;;  %v1672_v17 = vld [vmem:[%s5299_s5 + $0x10] sm:$0xff]  ;;  %v1741_v21 = vld [vmem:[%s5299_s5 + $0x238] sm:$0xff]  ;;  %v3228_v33 = vld [vmem:[%s5299_s5 + $0x948] sm:$0xff] }
 0x2ed   : > { %2051 = vmatpush1.msra.mxu1 %v1720_v42  ;;  %2439 = vmatprep.subr.mxu0 %v3178_v4  ;;  %v3276_v42 = vld [vmem:[%s5299_s5 + $0xac8] sm:$0xff]  ;;  %v3102_v63 = vld [vmem:[%s5299_s5 + $0x578] sm:$0xff] }
 0x2ee   : > { %2052 = vmatprep.subr.mxu1 %v1717_v44  ;;  %2440 = vmatpush1.msra.mxu0 %v3177_v6  ;;  %v4815_v4 = vsel %vm327_vm0, %v2647_v16, %v2648_v10  ;;  %v3275_v44 = vld [vmem:[%s5299_s5 + $0xac0] sm:$0xff]  ;;  %v1740_v6 = vld [vmem:[%s5299_s5 + $0x230] sm:$0xff]  ;;  %v3224_v16 = vld [vmem:[%s5299_s5 + $0x928] sm:$0xff] }
 0x2ef   : > { %2053 = vmatpush1.msra.mxu1 %v1716_v19  ;;  %2441 = vmatprep.subr.mxu0 %v3174_v22  ;;  %v3272_v19 = vld [vmem:[%s5299_s5 + $0xaa8] sm:$0xff]  ;;  %v1737_v22 = vld [vmem:[%s5299_s5 + $0x218] sm:$0xff]  ;;  %v3231_v10 = vld [vmem:[%s5299_s5 + $0x960] sm:$0xff] }
 0x2f0   : > { %2054 = vmatprep.subr.mxu1 %v1713_v23  ;;  %2442 = vmatpush1.msra.mxu0 %v3173_v15  ;;  %v3271_v23 = vld [vmem:[%s5299_s5 + $0xaa0] sm:$0xff]  ;;  %v1736_v15 = vld [vmem:[%s5299_s5 + $0x210] sm:$0xff] }
 0x2f1   : > { %2055 = vmatpush1.msra.mxu1 %v1712_v25  ;;  %2443 = vmatprep.subr.mxu0 %v3170_v46  ;;  %v3268_v25 = vld [vmem:[%s5299_s5 + $0xa88] sm:$0xff]  ;;  %v3134_v46 = vld [vmem:[%s5299_s5 + $0x678] sm:$0xff] }
 0x2f2   : > { %2056 = vmatprep.subr.mxu1 %v1709_v26  ;;  %2444 = vmatpush1.msra.mxu0 %v3169_v27  ;;  %v3267_v26 = vld [vmem:[%s5299_s5 + $0xa80] sm:$0xff]  ;;  %v3133_v27 = vld [vmem:[%s5299_s5 + $0x670] sm:$0xff] }
 0x2f3   : > { %2057 = vmatpush1.msra.mxu1 %v1708_v28  ;;  %2445 = vmatprep.subr.mxu0 %v3166_v29  ;;  %v3264_v28 = vld [vmem:[%s5299_s5 + $0xa68] sm:$0xff]  ;;  %v3130_v29 = vld [vmem:[%s5299_s5 + $0x658] sm:$0xff] }
 0x2f4   : > { %2058 = vmatprep.subr.mxu1 %v1705_v30  ;;  %2446 = vmatpush1.msra.mxu0 %v3165_v48  ;;  %v3263_v30 = vld [vmem:[%s5299_s5 + $0xa60] sm:$0xff]  ;;  %v3129_v48 = vld [vmem:[%s5299_s5 + $0x650] sm:$0xff] }
 0x2f5   : > { %2059 = vmatpush1.msra.mxu1 %v1704_v12  ;;  %2447 = vmatprep.subr.mxu0 %v3162_v31  ;;  %v3260_v12 = vld [vmem:[%s5299_s5 + $0xa48] sm:$0xff]  ;;  %v3126_v31 = vld [vmem:[%s5299_s5 + $0x638] sm:$0xff] }
 0x2f6   : > { %2060 = vmatprep.subr.mxu1 %v1701_v32  ;;  %2448 = vmatpush1.msra.mxu0 %v3161_v50  ;;  %v3259_v32 = vld [vmem:[%s5299_s5 + $0xa40] sm:$0xff]  ;;  %v3125_v50 = vld [vmem:[%s5299_s5 + $0x630] sm:$0xff] }
 0x2f7   : > { %2061 = vmatpush1.msra.mxu1 %v1700_v18  ;;  %2449 = vmatprep.subr.mxu0 %v3158_v35  ;;  %v3256_v18 = vld [vmem:[%s5299_s5 + $0xa28] sm:$0xff]  ;;  %v3255_v35 = vld [vmem:[%s5299_s5 + $0xa20] sm:$0xff] }
 0x2f8   : > { %2062 = vmatprep.subr.mxu1 %v1697_v36  ;;  %2450 = vmatpush1.msra.mxu0 %v3157_v37  ;;  %v3121_v36 = vld [vmem:[%s5299_s5 + $0x610] sm:$0xff]  ;;  %v3252_v37 = vld [vmem:[%s5299_s5 + $0xa08] sm:$0xff] }
 0x2f9   : > { %2063 = vmatpush1.msra.mxu1 %v1696_v38  ;;  %2451 = vmatprep.subr.mxu0 %v3154_v2  ;;  %v3118_v38 = vld [vmem:[%s5299_s5 + $0x5f8] sm:$0xff]  ;;  %v3251_v2 = vld [vmem:[%s5299_s5 + $0xa00] sm:$0xff] }
 0x2fa   : > { %2064 = vmatprep.subr.mxu1 %v1693_v39  ;;  %2452 = vmatpush1.msra.mxu0 %v3153_v43  ;;  %v3117_v39 = vld [vmem:[%s5299_s5 + $0x5f0] sm:$0xff]  ;;  %v3248_v43 = vld [vmem:[%s5299_s5 + $0x9e8] sm:$0xff] }
 0x2fb   : > { %2065 = vmatpush1.msra.mxu1 %v1692_v45  ;;  %2453 = vmatprep.subr.mxu0 %v3150_v47  ;;  %v3114_v45 = vld [vmem:[%s5299_s5 + $0x5d8] sm:$0xff]  ;;  %v3247_v47 = vld [vmem:[%s5299_s5 + $0x9e0] sm:$0xff] }
 0x2fc   : > { %2066 = vmatprep.subr.mxu1 %v1689_v49  ;;  %2454 = vmatpush1.msra.mxu0 %v3149_v52  ;;  %v3113_v49 = vld [vmem:[%s5299_s5 + $0x5d0] sm:$0xff]  ;;  %v3244_v52 = vld [vmem:[%s5299_s5 + $0x9c8] sm:$0xff] }
 0x2fd   : > { %2067 = vmatpush1.msra.mxu1 %v1688_v53  ;;  %2455 = vmatprep.subr.mxu0 %v3146_v54  ;;  %v3110_v53 = vld [vmem:[%s5299_s5 + $0x5b8] sm:$0xff]  ;;  %v3243_v54 = vld [vmem:[%s5299_s5 + $0x9c0] sm:$0xff] }
 0x2fe   : > { %2068 = vmatprep.subr.mxu1 %v1685_v55  ;;  %2456 = vmatpush1.msra.mxu0 %v3145_v56  ;;  %v3109_v55 = vld [vmem:[%s5299_s5 + $0x5b0] sm:$0xff]  ;;  %v3240_v56 = vld [vmem:[%s5299_s5 + $0x9a8] sm:$0xff] }
 0x2ff   : > { %2069 = vmatpush1.msra.mxu1 %v1684_v57  ;;  %2485 = vmatprep.subr.mxu0 %v3214_v58  ;;  %v3106_v57 = vld [vmem:[%s5299_s5 + $0x598] sm:$0xff]  ;;  %v3239_v58 = vld [vmem:[%s5299_s5 + $0x9a0] sm:$0xff] }
 0x300   : > { %2070 = vmatprep.subr.mxu1 %v1681_v61  ;;  %2486 = vmatpush2.msra.mxu0 %v3213_v62  ;;  %v3105_v61 = vld [vmem:[%s5299_s5 + $0x590] sm:$0xff]  ;;  %v3236_v62 = vld [vmem:[%s5299_s5 + $0x988] sm:$0xff] }
 0x301   : > { %2071 = vmatpush1.msra.mxu1 %v1680_v1  ;;  %2487 = vmatprep.subr.mxu0 %v3210_v3  ;;  %v3235_v1 = vld [vmem:[%s5299_s5 + $0x980] sm:$0xff]  ;;  %v3101_v3 = vld [vmem:[%s5299_s5 + $0x570] sm:$0xff] }
 0x302   : > { %2072 = vmatprep.subr.mxu1 %v1677_v5  ;;  %2488 = vmatpush2.msra.mxu0 %v3209_v8  ;;  %v3232_v5 = vld [vmem:[%s5299_s5 + $0x968] sm:$0xff]  ;;  %v3098_v8 = vld [vmem:[%s5299_s5 + $0x558] sm:$0xff] }
 0x303   : > { %2073 = vmatpush1.msra.mxu1 %v1676_v40  ;;  %2490 = vmatmul.mubr.f32.vlgmr.msra.gmra.mxu0 %v4801_v9  ;;  %v3097_v40 = vld [vmem:[%s5299_s5 + $0x550] sm:$0xff] }
 0x304   : > { %2653 = vmatprep.subr.mxu0 %v3280_v0  ;;  %2074 = vmatprep.subr.mxu1 %v1673_v11  ;;  %v3094_v0 = vld [vmem:[%s5299_s5 + $0x538] sm:$0xff]  ;;  %v3227_v11 = vld [vmem:[%s5299_s5 + $0x940] sm:$0xff] }
 0x305   : > { %2654 = vmatpush1.msra.mxu0 %v3279_v14  ;;  %3291 = vmatprep.mubr.msk.f32.mxu0 %vm1826_vm8, %v4815_v4  ;;  %v3093_v14 = vld [vmem:[%s5299_s5 + $0x530] sm:$0xff] }
 0x306   : > { %2075 = vmatpush1.msra.mxu1 %v1672_v17  ;;  %2655 = vmatprep.subr.mxu0 %v3276_v42  ;;  %v3090_v17 = vld [vmem:[%s5299_s5 + $0x518] sm:$0xff]  ;;  %v3223_v42 = vld [vmem:[%s5299_s5 + $0x920] sm:$0xff] }
 0x307   : > { %2104 = vmatprep.subr.mxu1 %v1741_v21  ;;  %2656 = vmatpush1.msra.mxu0 %v3275_v44  ;;  %v3089_v21 = vld [vmem:[%s5299_s5 + $0x510] sm:$0xff]  ;;  %v3220_v44 = vld [vmem:[%s5299_s5 + $0x908] sm:$0xff] }
 0x308   : > { %2105 = vmatpush2.msra.mxu1 %v1740_v6  ;;  %2657 = vmatprep.subr.mxu0 %v3272_v19  ;;  %v3086_v6 = vld [vmem:[%s5299_s5 + $0x4f8] sm:$0xff]  ;;  %v3219_v19 = vld [vmem:[%s5299_s5 + $0x900] sm:$0xff] }
 0x309   : > { %2106 = vmatprep.subr.mxu1 %v1737_v22  ;;  %2658 = vmatpush1.msra.mxu0 %v3271_v23  ;;  %v3085_v22 = vld [vmem:[%s5299_s5 + $0x4f0] sm:$0xff]  ;;  %v3288_v23 = vld [vmem:[%s5299_s5 + $0xb28] sm:$0xff] }
 0x30a   : > { %2107 = vmatpush2.msra.mxu1 %v1736_v15  ;;  %2659 = vmatprep.subr.mxu0 %v3268_v25  ;;  %v3082_v15 = vld [vmem:[%s5299_s5 + $0x4d8] sm:$0xff]  ;;  %v3287_v25 = vld [vmem:[%s5299_s5 + $0xb20] sm:$0xff] }
 0x30b   : > { %2109 = vmatmul.mubr.f32.vlgmr.msra.gmra.mxu1 %v4338_v20  ;;  %2268 = vmatprep.subr.mxu1 %v3134_v46  ;;  %v2645_v46 = vrot.slane %v4350_v24, 4  ;;  %v3283_v24 = vld [vmem:[%s5299_s5 + $0xb00] sm:$0xff] }
 0x30c   : > { %2660 = vmatpush1.msra.mxu0 %v3267_v26  ;;  %2269 = vmatpush1.msra.mxu1 %v3133_v27  ;;  %v3081_v26 = vld [vmem:[%s5299_s5 + $0x4d0] sm:$0xff]  ;;  %v3284_v27 = vld [vmem:[%s5299_s5 + $0xb08] sm:$0xff] }
 0x30d   : > { %3144 = vmatprep.mubr.msk.f32.mxu1 %vm1826_vm8, %v4388_v34  ;;  %2661 = vmatprep.subr.mxu0 %v3264_v28  ;;  %v3122_v34 = vld [vmem:[%s5299_s5 + $0x618] sm:$0xff] }
 0x30e   : > { %2270 = vmatprep.subr.mxu1 %v3130_v29  ;;  %2662 = vmatpush1.msra.mxu0 %v3263_v30  ;;  %v3078_v28 = vld [vmem:[%s5299_s5 + $0x4b8] sm:$0xff]  ;;  %v3077_v29 = vld [vmem:[%s5299_s5 + $0x4b0] sm:$0xff]  ;;  %v2644_v30 = vrot.slane %v4338_v20, 4 }
 0x30f   : > { %2271 = vmatpush1.msra.mxu1 %v3129_v48  ;;  %2663 = vmatprep.subr.mxu0 %v3260_v12  ;;  %v3074_v48 = vld [vmem:[%s5299_s5 + $0x498] sm:$0xff] }
 0x310   : > { %2272 = vmatprep.subr.mxu1 %v3126_v31  ;;  %2664 = vmatpush1.msra.mxu0 %v3259_v32  ;;  %v5029_v12 = vsel %vm327_vm0, %v2644_v30, %v2645_v46  ;;  %v3073_v31 = vld [vmem:[%s5299_s5 + $0x490] sm:$0xff]  ;;  %v3142_v20 = vld [vmem:[%s5299_s5 + $0x6b8] sm:$0xff] }
 0x311   : > { %2273 = vmatpush1.msra.mxu1 %v3125_v50  ;;  %2665 = vmatprep.subr.mxu0 %v3256_v18  ;;  %v3141_v32 = vld [vmem:[%s5299_s5 + $0x6b0] sm:$0xff]  ;;  %v3138_v50 = vld [vmem:[%s5299_s5 + $0x698] sm:$0xff] }
 0x312   : > { %2274 = vmatprep.subr.mxu1 %v3122_v34  ;;  %2666 = vmatpush1.msra.mxu0 %v3255_v35  ;;  %v3137_v18 = vld [vmem:[%s5299_s5 + $0x690] sm:$0xff]  ;;  %v3208_v34 = vld [vmem:[%s5299_s5 + $0x8b8] sm:$0xff] }
 0x313   : > { %2275 = vmatpush1.msra.mxu1 %v3121_v36  ;;  %2667 = vmatprep.subr.mxu0 %v3252_v37  ;;  %v3207_v35 = vld [vmem:[%s5299_s5 + $0x8b0] sm:$0xff]  ;;  %v3204_v36 = vld [vmem:[%s5299_s5 + $0x898] sm:$0xff] }
 0x314   : > { %2276 = vmatprep.subr.mxu1 %v3118_v38  ;;  %2668 = vmatpush1.msra.mxu0 %v3251_v2  ;;  %v3203_v37 = vld [vmem:[%s5299_s5 + $0x890] sm:$0xff]  ;;  %v3200_v38 = vld [vmem:[%s5299_s5 + $0x878] sm:$0xff] }
 0x315   : > { %2277 = vmatpush1.msra.mxu1 %v3117_v39  ;;  %2669 = vmatprep.subr.mxu0 %v3248_v43  ;;  %v3199_v2 = vld [vmem:[%s5299_s5 + $0x870] sm:$0xff]  ;;  %v3262_v46 = vld [vmem:[%s5299_s5 + $0xa58] sm:$0xff] }
 0x316   : > { %2278 = vmatprep.subr.mxu1 %v3114_v45  ;;  %2670 = vmatpush1.msra.mxu0 %v3247_v47  ;;  %v3195_v39 = vld [vmem:[%s5299_s5 + $0x850] sm:$0xff]  ;;  %v3188_v45 = vld [vmem:[%s5299_s5 + $0x818] sm:$0xff] }
 0x317   : > { %2279 = vmatpush1.msra.mxu1 %v3113_v49  ;;  %2671 = vmatprep.subr.mxu0 %v3244_v52  ;;  %v3191_v43 = vld [vmem:[%s5299_s5 + $0x830] sm:$0xff]  ;;  %v3184_v49 = vld [vmem:[%s5299_s5 + $0x7f8] sm:$0xff] }
 0x318   : > { %2280 = vmatprep.subr.mxu1 %v3110_v53  ;;  %2672 = vmatpush1.msra.mxu0 %v3243_v54  ;;  %v3187_v47 = vld [vmem:[%s5299_s5 + $0x810] sm:$0xff]  ;;  %v3180_v53 = vld [vmem:[%s5299_s5 + $0x7d8] sm:$0xff] }
 0x319   : > { %2281 = vmatpush1.msra.mxu1 %v3109_v55  ;;  %2673 = vmatprep.subr.mxu0 %v3240_v56  ;;  %v3183_v52 = vld [vmem:[%s5299_s5 + $0x7f0] sm:$0xff]  ;;  %v3176_v55 = vld [vmem:[%s5299_s5 + $0x7b8] sm:$0xff] }
 0x31a   : > { %2282 = vmatprep.subr.mxu1 %v3106_v57  ;;  %2674 = vmatpush1.msra.mxu0 %v3239_v58  ;;  %v3179_v54 = vld [vmem:[%s5299_s5 + $0x7d0] sm:$0xff]  ;;  %v3172_v57 = vld [vmem:[%s5299_s5 + $0x798] sm:$0xff] }
 0x31b   : > { %2283 = vmatpush1.msra.mxu1 %v3105_v61  ;;  %2675 = vmatprep.subr.mxu0 %v3236_v62  ;;  %v3175_v56 = vld [vmem:[%s5299_s5 + $0x7b0] sm:$0xff]  ;;  %v3168_v61 = vld [vmem:[%s5299_s5 + $0x778] sm:$0xff] }
 0x31c   : > { %2284 = vmatprep.subr.mxu1 %v3102_v63  ;;  %2676 = vmatpush1.msra.mxu0 %v3235_v1  ;;  %v3171_v58 = vld [vmem:[%s5299_s5 + $0x790] sm:$0xff]  ;;  %v3164_v63 = vld [vmem:[%s5299_s5 + $0x758] sm:$0xff] }
 0x31d   : > { %2285 = vmatpush1.msra.mxu1 %v3101_v3  ;;  %2677 = vmatprep.subr.mxu0 %v3232_v5  ;;  %v3167_v62 = vld [vmem:[%s5299_s5 + $0x770] sm:$0xff]  ;;  %v3160_v3 = vld [vmem:[%s5299_s5 + $0x738] sm:$0xff] }
 0x31e   : > { %2286 = vmatprep.subr.mxu1 %v3098_v8  ;;  %2678 = vmatpush1.msra.mxu0 %v3231_v10  ;;  %v3163_v1 = vld [vmem:[%s5299_s5 + $0x750] sm:$0xff]  ;;  %v3156_v8 = vld [vmem:[%s5299_s5 + $0x718] sm:$0xff] }
 0x31f   : > { %2287 = vmatpush1.msra.mxu1 %v3097_v40  ;;  %2679 = vmatprep.subr.mxu0 %v3228_v33  ;;  %v3159_v5 = vld [vmem:[%s5299_s5 + $0x730] sm:$0xff]  ;;  %v3152_v40 = vld [vmem:[%s5299_s5 + $0x6f8] sm:$0xff] }
 0x320   : > { %2288 = vmatprep.subr.mxu1 %v3094_v0  ;;  %2680 = vmatpush1.msra.mxu0 %v3227_v11  ;;  %v3155_v10 = vld [vmem:[%s5299_s5 + $0x710] sm:$0xff]  ;;  %v3148_v0 = vld [vmem:[%s5299_s5 + $0x6d8] sm:$0xff] }
 0x321   : > { %2289 = vmatpush1.msra.mxu1 %v3093_v14  ;;  %2681 = vmatprep.subr.mxu0 %v3224_v16  ;;  %v3151_v33 = vld [vmem:[%s5299_s5 + $0x6f0] sm:$0xff]  ;;  %v3216_v14 = vld [vmem:[%s5299_s5 + $0x8f8] sm:$0xff] }
 0x322   : > { %2290 = vmatprep.subr.mxu1 %v3090_v17  ;;  %2682 = vmatpush1.msra.mxu0 %v3223_v42  ;;  %v3147_v11 = vld [vmem:[%s5299_s5 + $0x6d0] sm:$0xff]  ;;  %v3212_v17 = vld [vmem:[%s5299_s5 + $0x8d8] sm:$0xff] }
 0x323   : > { %2291 = vmatpush1.msra.mxu1 %v3089_v21  ;;  %2683 = vmatprep.subr.mxu0 %v3220_v44  ;;  %v3215_v16 = vld [vmem:[%s5299_s5 + $0x8f0] sm:$0xff]  ;;  %v3282_v21 = vld [vmem:[%s5299_s5 + $0xaf8] sm:$0xff] }
 0x324   : > { %2292 = vmatprep.subr.mxu1 %v3086_v6  ;;  %2684 = vmatpush1.msra.mxu0 %v3219_v19  ;;  %v3211_v42 = vld [vmem:[%s5299_s5 + $0x8d0] sm:$0xff]  ;;  %v3278_v6 = vld [vmem:[%s5299_s5 + $0xad8] sm:$0xff] }
 0x325   : > { %2293 = vmatpush1.msra.mxu1 %v3085_v22  ;;  %2713 = vmatprep.subr.mxu0 %v3288_v23  ;;  %v3281_v44 = vld [vmem:[%s5299_s5 + $0xaf0] sm:$0xff]  ;;  %v3274_v22 = vld [vmem:[%s5299_s5 + $0xab8] sm:$0xff] }
 0x326   : > { %2294 = vmatprep.subr.mxu1 %v3082_v15  ;;  %2714 = vmatpush2.msra.mxu0 %v3287_v25  ;;  %v3277_v19 = vld [vmem:[%s5299_s5 + $0xad0] sm:$0xff]  ;;  %v3250_v30 = vld [vmem:[%s5299_s5 + $0x9f8] sm:$0xff] }
 0x327   : > { %2295 = vmatpush1.msra.mxu1 %v3081_v26  ;;  %2715 = vmatprep.subr.mxu0 %v3284_v27  ;;  %v3273_v23 = vld [vmem:[%s5299_s5 + $0xab0] sm:$0xff]  ;;  %v3258_v27 = vld [vmem:[%s5299_s5 + $0xa38] sm:$0xff] }
 0x328   : > { %2296 = vmatprep.subr.mxu1 %v3078_v28  ;;  %2716 = vmatpush2.msra.mxu0 %v3283_v24  ;;  %v3269_v15 = vld [vmem:[%s5299_s5 + $0xa90] sm:$0xff]  ;;  %v3254_v24 = vld [vmem:[%s5299_s5 + $0xa18] sm:$0xff] }
 0x329   : > { %2297 = vmatpush1.msra.mxu1 %v3077_v29  ;;  %2718 = vmatmul.mubr.f32.vlgmr.msra.gmra.mxu0 %v5029_v12  ;;  %v3265_v25 = vld [vmem:[%s5299_s5 + $0xa70] sm:$0xff] }
 0x32a   : > { %2298 = vmatprep.subr.mxu1 %v3074_v48  ;;  %v3261_v26 = vld [vmem:[%s5299_s5 + $0xa50] sm:$0xff] }
 0x32b   : > { %2299 = vmatpush1.msra.mxu1 %v3073_v31  ;;  %v3257_v28 = vld [vmem:[%s5299_s5 + $0xa30] sm:$0xff]  ;;  %v3246_v31 = vld [vmem:[%s5299_s5 + $0x9d8] sm:$0xff] }
 0x32c   : > { %2328 = vmatprep.subr.mxu1 %v3142_v20  ;;  %v3253_v29 = vld [vmem:[%s5299_s5 + $0xa10] sm:$0xff] }
 0x32d   : > { %2329 = vmatpush2.msra.mxu1 %v3141_v32  ;;  %v3249_v48 = vld [vmem:[%s5299_s5 + $0x9f0] sm:$0xff]  ;;  %v3242_v32 = vld [vmem:[%s5299_s5 + $0x9b8] sm:$0xff] }
 0x32e   : > { %2330 = vmatprep.subr.mxu1 %v3138_v50  ;;  %v3245_v20 = vld [vmem:[%s5299_s5 + $0x9d0] sm:$0xff] }
 0x32f   : > { %2331 = vmatpush2.msra.mxu1 %v3137_v18  ;;  %v3241_v50 = vld [vmem:[%s5299_s5 + $0x9b0] sm:$0xff]  ;;  %v3238_v18 = vld [vmem:[%s5299_s5 + $0x998] sm:$0xff] }
 0x330   : > { %2333 = vmatmul.mubr.f32.vlgmr.msra.gmra.mxu1 %v4569_v41  ;;  %2496 = vmatprep.subr.mxu1 %v3208_v34  ;;  %v3196_v41 = vld [vmem:[%s5299_s5 + $0x858] sm:$0xff]  ;;  %v3237_v34 = vld [vmem:[%s5299_s5 + $0x990] sm:$0xff] }
 0x331   : > { %2497 = vmatpush1.msra.mxu1 %v3207_v35  ;;  %3218 = vmatprep.mubr.msk.f32.mxu1 %vm1826_vm8, %v4583_v51  ;;  %v3192_v51 = vld [vmem:[%s5299_s5 + $0x838] sm:$0xff] }
 0x332   : > { %2498 = vmatprep.subr.mxu1 %v3204_v36  ;;  %v3234_v35 = vld [vmem:[%s5299_s5 + $0x978] sm:$0xff]  ;;  %v3233_v36 = vld [vmem:[%s5299_s5 + $0x970] sm:$0xff] }
 0x333   : > { %2499 = vmatpush1.msra.mxu1 %v3203_v37  ;;  %v3230_v37 = vld [vmem:[%s5299_s5 + $0x958] sm:$0xff] }
 0x334   : > { %2500 = vmatprep.subr.mxu1 %v3200_v38  ;;  %v3229_v38 = vld [vmem:[%s5299_s5 + $0x950] sm:$0xff] }
 0x335   : > { %2501 = vmatpush1.msra.mxu1 %v3199_v2  ;;  %v3226_v2 = vld [vmem:[%s5299_s5 + $0x938] sm:$0xff] }
 0x336   : > { %2502 = vmatprep.subr.mxu1 %v3196_v41  ;;  %v3225_v41 = vld [vmem:[%s5299_s5 + $0x930] sm:$0xff] }
 0x337   : > { %2503 = vmatpush1.msra.mxu1 %v3195_v39  ;;  %v3222_v39 = vld [vmem:[%s5299_s5 + $0x918] sm:$0xff] }
 0x338   : > { %2504 = vmatprep.subr.mxu1 %v3192_v51  ;;  %v3221_v51 = vld [vmem:[%s5299_s5 + $0x910] sm:$0xff] }
 0x339   : > { %2505 = vmatpush1.msra.mxu1 %v3191_v43  ;;  %v3290_v43 = vld [vmem:[%s5299_s5 + $0xb38] sm:$0xff] }
 0x33a   : > { %2506 = vmatprep.subr.mxu1 %v3188_v45  ;;  %v3289_v45 = vld [vmem:[%s5299_s5 + $0xb30] sm:$0xff] }
 0x33b   : > { %2507 = vmatpush1.msra.mxu1 %v3187_v47  ;;  %v3286_v47 = vld [vmem:[%s5299_s5 + $0xb18] sm:$0xff] }
 0x33c   : > { %2508 = vmatprep.subr.mxu1 %v3184_v49  ;;  %v3285_v49 = vld [vmem:[%s5299_s5 + $0xb10] sm:$0xff] }
 0x33d   : > { %2509 = vmatpush1.msra.mxu1 %v3183_v52 }
 0x33e   : > { %2510 = vmatprep.subr.mxu1 %v3180_v53 }
 0x33f   : > { %2511 = vmatpush1.msra.mxu1 %v3179_v54 }
 0x340   : > { %2512 = vmatprep.subr.mxu1 %v3176_v55 }
 0x341   : > { %2513 = vmatpush1.msra.mxu1 %v3175_v56 }
 0x342   : > { %2514 = vmatprep.subr.mxu1 %v3172_v57 }
 0x343   : > { %2515 = vmatpush1.msra.mxu1 %v3171_v58 }
 0x344   : > { %2516 = vmatprep.subr.mxu1 %v3168_v61 }
 0x345   : > { %2517 = vmatpush1.msra.mxu1 %v3167_v62  ;;  %v2799_v62 = vld [vmem:[%s5300_s6] sm:$0xf] }
 0x346   : > { %2518 = vmatprep.subr.mxu1 %v3164_v63 }
 0x347   : > { %2519 = vmatpush1.msra.mxu1 %v3163_v1 }
 0x348   : > { %2520 = vmatprep.subr.mxu1 %v3160_v3 }
 0x349   : > { %2521 = vmatpush1.msra.mxu1 %v3159_v5 }
 0x34a   : > { %2522 = vmatprep.subr.mxu1 %v3156_v8 }
 0x34b   : > { %2523 = vmatpush1.msra.mxu1 %v3155_v10 }
 0x34c   : > { %2524 = vmatprep.subr.mxu1 %v3152_v40 }
 0x34d   : > { %2525 = vmatpush1.msra.mxu1 %v3151_v33 }
 0x34e   : > { %2526 = vmatprep.subr.mxu1 %v3148_v0  ;;  %v2808_v0 = vrot.slane %v2799_v62, %v1309_v60 }
 0x34f   : > { %2527 = vmatpush1.msra.mxu1 %v3147_v11 }
 0x350   : > { %2556 = vmatprep.subr.mxu1 %v3216_v14 }
 0x351   : > { %2557 = vmatpush2.msra.mxu1 %v3215_v16 }
 0x352   : > { %2558 = vmatprep.subr.mxu1 %v3212_v17 }
 0x353   : > { %2559 = vmatpush2.msra.mxu1 %v3211_v42 }
 0x354   : > { %2561 = vmatmul.mubr.f32.vlgmr.msra.gmra.mxu1 %v4801_v9  ;;  %2724 = vmatprep.subr.mxu1 %v3282_v21  ;;  %v3270_v9 = vld [vmem:[%s5299_s5 + $0xa98] sm:$0xff] }
 0x355   : > { %2725 = vmatpush1.msra.mxu1 %v3281_v44  ;;  %3292 = vmatprep.mubr.msk.f32.mxu1 %vm1826_vm8, %v4815_v4  ;;  %v3266_v4 = vld [vmem:[%s5299_s5 + $0xa78] sm:$0xff] }
 0x356   : > { %2726 = vmatprep.subr.mxu1 %v3278_v6 }
 0x357   : > { %2727 = vmatpush1.msra.mxu1 %v3277_v19 }
 0x358   : > { %2728 = vmatprep.subr.mxu1 %v3274_v22 }
 0x359   : > { %2729 = vmatpush1.msra.mxu1 %v3273_v23 }
 0x35a   : > { %2730 = vmatprep.subr.mxu1 %v3270_v9 }
 0x35b   : > { %2731 = vmatpush1.msra.mxu1 %v3269_v15 }
 0x35c   : > { %2732 = vmatprep.subr.mxu1 %v3266_v4 }
 0x35d   : > { %2733 = vmatpush1.msra.mxu1 %v3265_v25  ;;  %v2815_v25 = vsub.s32 3, %v4078_v7 }
 0x35e   : > { %2734 = vmatprep.subr.mxu1 %v3262_v46 }
 0x35f   : > { %2735 = vmatpush1.msra.mxu1 %v3261_v26 }
 0x360   : > { %2736 = vmatprep.subr.mxu1 %v3258_v27 }
 0x361   : > { %2737 = vmatpush1.msra.mxu1 %v3257_v28  ;;  %v2812_v28 = vrot.slane %v2799_v62, %v1313_v13 }
 0x362   : > { %2738 = vmatprep.subr.mxu1 %v3254_v24 }
 0x363   : > { %2739 = vmatpush1.msra.mxu1 %v3253_v29 }
 0x364   : > { %2740 = vmatprep.subr.mxu1 %v3250_v30 }
 0x365   : > { %2741 = vmatpush1.msra.mxu1 %v3249_v48  ;;  %v2816_v48 = vrot.slane %v2799_v62, %v2815_v25 }
 0x366   : > { %2742 = vmatprep.subr.mxu1 %v3246_v31 }
 0x367   : > { %2743 = vmatpush1.msra.mxu1 %v3245_v20 }
 0x368   : > { %2744 = vmatprep.subr.mxu1 %v3242_v32 }
 0x369   : > { %2745 = vmatpush1.msra.mxu1 %v3241_v50 }
 0x36a   : > { %2746 = vmatprep.subr.mxu1 %v3238_v18 }
 0x36b   : > { %2747 = vmatpush1.msra.mxu1 %v3237_v34 }
 0x36c   : > { %2748 = vmatprep.subr.mxu1 %v3234_v35 }
 0x36d   : > { %2749 = vmatpush1.msra.mxu1 %v3233_v36 }
 0x36e   : > { %2750 = vmatprep.subr.mxu1 %v3230_v37 }
 0x36f   : > { %2751 = vmatpush1.msra.mxu1 %v3229_v38 }
 0x370   : > { %2752 = vmatprep.subr.mxu1 %v3226_v2 }
 0x371   : > { %2753 = vmatpush1.msra.mxu1 %v3225_v41 }
 0x372   : > { %2754 = vmatprep.subr.mxu1 %v3222_v39 }
 0x373   : > { %2755 = vmatpush1.msra.mxu1 %v3221_v51 }
 0x374   : > { %2784 = vmatprep.subr.mxu1 %v3290_v43 }
 0x375   : > { %2785 = vmatpush2.msra.mxu1 %v3289_v45 }
 0x376   : > { %2786 = vmatprep.subr.mxu1 %v3286_v47 }
 0x377   : > { %2787 = vmatpush2.msra.mxu1 %v3285_v49 }
 0x378   : > { %2789 = vmatmul.mubr.f32.vlgmr.msra.gmra.mxu1 %v5029_v12  ;;  %v2039_v52 = vpop.f32.mrf.mxu0  ;;  %v2804_v12 = vrot.slane %v2799_v62, %v1305_v59 }
 0x37a   : > { %v2041_v53 = vpop.f32.mrf.mxu0 }
 0x37f   : > { %v1895_v55 = vpop.f32.mrf.mxu1 }
 0x380   : > { %v2040_v61 = vadd.f32 %v2039_v52, %v1895_v55 }
 0x381   : > { %v1897_v57 = vpop.f32.mrf.mxu1 }
 0x382   : > { %v2042_v63 = vadd.f32 %v2041_v53, %v1897_v57 }
 0x39d   : > { %v2263_v54 = vpop.f32.mrf.mxu0 }
 0x39e   : > { %v2339_v1 = vadd.f32 %v2263_v54, %v2040_v61 }
 0x39f   : > { %v2265_v56 = vpop.f32.mrf.mxu0 }
 0x3a0   : > { %v2340_v5 = vadd.f32 %v2265_v56, %v2042_v63 }
 0x3a5   : > { %v1966_v21 = vpop.f32.mrf.mxu1 }
 0x3a7   : > { %v1968_v44 = vpop.f32.mrf.mxu1 }
 0x3c3   : > { %v2491_v58 = vpop.f32.mrf.mxu0 }
 0x3c4   : > { %v2567_v8 = vadd.f32 %v2491_v58, %v2339_v1 }
 0x3c5   : > { %v2493_v3 = vpop.f32.mrf.mxu0 }
 0x3c6   : > { %v2568_v40 = vadd.f32 %v2493_v3, %v2340_v5 }
 0x3cb   : > { %v2110_v6 = vpop.f32.mrf.mxu1 }
 0x3cc   : > { %v2111_v9 = vadd.f32 %v2110_v6, %v1966_v21 }
 0x3cd   : > { %v2112_v60 = vpop.f32.mrf.mxu1 }
 0x3ce   : > { %v2113_v15 = vadd.f32 %v2112_v60, %v1968_v44 }
 0x3e9   : > { %v2719_v10 = vpop.f32.mrf.mxu0 }
 0x3ea   : > { %v2795_v33 = vadd.f32 %v2719_v10, %v2567_v8 }
 0x3eb   : > { %v2721_v11 = vpop.f32.mrf.mxu0 }
 0x3ec   : > { %v2821_v14 = vadd.f32 %v2804_v12, %v2795_v33  ;;  %v2796_v16 = vadd.f32 %v2721_v11, %v2568_v40 }
 0x3ee   : > { %v2825_v17 = vmax.f32 %v2821_v14, 0.0  ;;  %v2822_v42 = vadd.f32 %v2808_v0, %v2796_v16 }
 0x3f0   : > { %2829 = vst [vmem:[%s5282_s20] sm:$0xff] %v2825_v17  ;;  %v2826_v59 = vmax.f32 %v2822_v42, 0.0  ;;  %v2334_v19 = vpop.f32.mrf.mxu1 }
 0x3f1   : > { %v2341_v4 = vadd.f32 %v2334_v19, %v2111_v9 }
 0x3f2   : > { %2830 = vst [vmem:[%s5282_s20 + $0x8] sm:$0xff] %v2826_v59  ;;  %v2336_v22 = vpop.f32.mrf.mxu1 }
 0x3f3   : > { %v2342_v26 = vadd.f32 %v2336_v22, %v2113_v15 }
 0x414   : > { %v2562_v23 = vpop.f32.mrf.mxu1 }
 0x415   : > { %v2569_v27 = vadd.f32 %v2562_v23, %v2341_v4 }
 0x416   : > { %v2564_v46 = vpop.f32.mrf.mxu1 }
 0x417   : > { %v2570_v29 = vadd.f32 %v2564_v46, %v2342_v26 }
 0x438   : > { %v2790_v24 = vpop.f32.mrf.mxu1 }
 0x439   : > { %v2797_v30 = vadd.f32 %v2790_v24, %v2569_v27 }
 0x43a   : > { %v2792_v31 = vpop.f32.mrf.mxu1 }
 0x43b   : > { %v2823_v20 = vadd.f32 %v2812_v28, %v2797_v30  ;;  %v2798_v32 = vadd.f32 %v2792_v31, %v2570_v29 }
 0x43d   : > { %v2827_v50 = vmax.f32 %v2823_v20, 0.0  ;;  %v2824_v18 = vadd.f32 %v2816_v48, %v2798_v32 }
 0x43f   : > { %2831 = vst [vmem:[%s5282_s20 + $0x10] sm:$0xff] %v2827_v50  ;;  %v2828_v34 = vmax.f32 %v2824_v18, 0.0 }
 0x441   : > { %2832 = vst [vmem:[%s5282_s20 + $0x18] sm:$0xff] %v2828_v34 }
 0x442 PF: > { %s17_s24 = sadd.s32 1, %s3433_s24  }
 0x443   : > { %p14_p4 = scmp.ge.s32.totalorder %s17_s24, 4  }
 0x445   :  { %16 = sbr.rel (!%p14_p4) target bundleno = 1 (0x1), region = 86 }

</bundles_post_ra>
